<compile_context>
chip_gen: v6e
topology: v6e:2x2x1
jax: 0.10.0
libtpu: 0.0.40
codegen_flags: <defaults>
</compile_context>

<pallas_src>
import functools

import jax
import jax.numpy as jnp
from jax.experimental import pallas as pl
from jax.experimental.pallas import tpu as pltpu


def rq_kernel(state_ref, w1_ref, b1_ref, wih_ref, whh_ref, bg_ref,
              hc0_ref, w3_ref, b3_ref,
              q_ref, hc_ref):
    """fc1 + ReLU, unrolled LSTM recurrence, fc3 — one kernel invocation.

    Inputs (whole-array VMEM blocks; Fp/Hp/Ap are the 128-padded sizes):
      state (T, S)  f32       w1  (S, Fp)   bf16    b1 (1, Fp)  f32
      wih   (Fp, 4Hp) bf16    whh (Hp, 4Hp) bf16    bg (1, 4Hp) f32  (= b_ih + b_hh)
      hc0   (2, Hp) f32  (row 0 = h0, row 1 = c0)
      w3    (Hp, Ap) bf16     b3  (1, Ap)   f32
    Outputs:
      q (T, Ap) f32,  hc (2, Hp) f32 (row 0 = h_n, row 1 = c_n)
    """
    Hp = hc_ref.shape[1]
    T = q_ref.shape[0]

    # fc1 + ReLU: (T, S) @ (S, Fp) -> (T, Fp); bf16 operands, f32 accumulation.
    x1 = jnp.dot(state_ref[...].astype(jnp.bfloat16), w1_ref[...],
                 preferred_element_type=jnp.float32) + b1_ref[...]
    x1 = jnp.maximum(x1, 0.0)

    # Input contribution to all gates for all timesteps at once, kept in vregs.
    xg = jnp.dot(x1.astype(jnp.bfloat16), wih_ref[...],
                 preferred_element_type=jnp.float32) + bg_ref[...]      # (T, 4Hp)

    h = hc0_ref[0:1, :]     # (1, Hp) f32
    c = hc0_ref[1:2, :]     # (1, Hp) f32

    hs = []
    for t in range(T):      # static unroll: T is a compile-time constant
        gates = xg[t:t + 1, :] + jnp.dot(
            h.astype(jnp.bfloat16), whh_ref[...],
            preferred_element_type=jnp.float32)                          # (1, 4Hp)
        # 128-aligned lane slices -> exactly one vreg per gate.
        i = jax.nn.sigmoid(gates[:, 0 * Hp:1 * Hp])
        f = jax.nn.sigmoid(gates[:, 1 * Hp:2 * Hp])
        g = jnp.tanh(gates[:, 2 * Hp:3 * Hp])
        o = jax.nn.sigmoid(gates[:, 3 * Hp:4 * Hp])
        c = f * c + i * g
        h = o * jnp.tanh(c)
        hs.append(h)

    # Final hidden state: single lane-dense (2, Hp) store.
    hc_ref[...] = jnp.concatenate([h, c], axis=0)

    # fc3: (T, Hp) @ (Hp, Ap) -> (T, Ap); single lane-dense output store.
    hseq = jnp.concatenate(hs, axis=0)
    q_ref[...] = jnp.dot(hseq.astype(jnp.bfloat16), w3_ref[...],
                         preferred_element_type=jnp.float32) + b3_ref[...]


def init_params(key, state_size, action_size, fc1_units=64, hidden_size=64):
    """Deterministic synthetic parameters in PyTorch shapes."""
    ks = jax.random.split(key, 9)
    S, F, H, A = state_size, fc1_units, hidden_size, action_size
    scale = 0.1
    params = {
        # nn.Linear(state_size, fc1_units): weight (F, S), bias (F,)
        "fc1_w": scale * jax.random.normal(ks[0], (F, S), jnp.float32),
        "fc1_b": scale * jax.random.normal(ks[1], (F,), jnp.float32),
        # nn.LSTM(F, H): weight_ih_l0 (4H, F), weight_hh_l0 (4H, H), biases (4H,)
        "w_ih": scale * jax.random.normal(ks[2], (4 * H, F), jnp.float32),
        "w_hh": scale * jax.random.normal(ks[3], (4 * H, H), jnp.float32),
        "b_ih": scale * jax.random.normal(ks[4], (4 * H,), jnp.float32),
        "b_hh": scale * jax.random.normal(ks[5], (4 * H,), jnp.float32),
        # nn.Linear(H, action_size): weight (A, H), bias (A,)
        "fc3_w": scale * jax.random.normal(ks[6], (A, H), jnp.float32),
        "fc3_b": scale * jax.random.normal(ks[7], (A,), jnp.float32),
    }
    # init_hidden_layer(): hc = (0.001*randn(1,1,H), 0.001*randn(1,1,H))
    h0 = 0.001 * jax.random.normal(ks[8], (2, 1, 1, H), jnp.float32)
    return params, (h0[0], h0[1])


def prepare_params(params, pad=128):
    """One-time (non-jit, outside the per-call path) weight prep:
    transpose to (in, out), fold b_ih + b_hh, zero-pad F/H/A to `pad` lanes
    (each LSTM gate gets its own 128-lane slot), cast matmul operands to bf16."""
    F, S = params["fc1_w"].shape
    H = params["w_hh"].shape[1]
    A = params["fc3_w"].shape[0]
    Fp = Hp = Ap = pad

    # fc1
    w1p = jnp.zeros((S, Fp), jnp.float32).at[:, :F].set(params["fc1_w"].T)
    b1p = jnp.zeros((1, Fp), jnp.float32).at[:, :F].set(params["fc1_b"])

    # LSTM (PyTorch gate order [i, f, g, o]); each H-wide gate -> its own Hp slot.
    wih_t = params["w_ih"].T                      # (F, 4H)
    whh_t = params["w_hh"].T                      # (H, 4H)
    bg = params["b_ih"] + params["b_hh"]          # (4H,)
    wihp = jnp.zeros((Fp, 4 * Hp), jnp.float32)
    whhp = jnp.zeros((Hp, 4 * Hp), jnp.float32)
    bgp = jnp.zeros((1, 4 * Hp), jnp.float32)
    for k in range(4):
        wihp = wihp.at[:F, k * Hp:k * Hp + H].set(wih_t[:, k * H:(k + 1) * H])
        whhp = whhp.at[:H, k * Hp:k * Hp + H].set(whh_t[:, k * H:(k + 1) * H])
        bgp = bgp.at[:, k * Hp:k * Hp + H].set(bg[k * H:(k + 1) * H])

    # fc3
    w3p = jnp.zeros((Hp, Ap), jnp.float32).at[:H, :A].set(params["fc3_w"].T)
    b3p = jnp.zeros((1, Ap), jnp.float32).at[:, :A].set(params["fc3_b"])

    return {
        "w1": w1p.astype(jnp.bfloat16), "b1": b1p,
        "wih": wihp.astype(jnp.bfloat16), "whh": whhp.astype(jnp.bfloat16),
        "bg": bgp,
        "w3": w3p.astype(jnp.bfloat16), "b3": b3p,
    }


@functools.partial(jax.jit, static_argnames=("action_size",))
def rq_forward(state, pp, h0, c0, *, action_size):
    """Equivalent of RQNetwork.forward(state, hidden=(h0, c0), update_hidden=False).

    state: (T, state_size); pp: output of prepare_params; h0/c0: (1, 1, H).
    Returns (q, (h_n, c_n)) with q (T, 1, action_size), h_n/c_n (1, 1, H).
    """
    T = state.shape[0]
    H = h0.shape[-1]
    Hp = pp["whh"].shape[0]
    Ap = pp["w3"].shape[1]

    hc0 = jnp.zeros((2, Hp), jnp.float32)
    hc0 = hc0.at[0, :H].set(h0.reshape(H))
    hc0 = hc0.at[1, :H].set(c0.reshape(H))

    vmem = pl.BlockSpec(memory_space=pltpu.MemorySpace.VMEM)
    q_pad, hc_new = pl.pallas_call(
        rq_kernel,
        out_shape=(
            jax.ShapeDtypeStruct((T, Ap), jnp.float32),
            jax.ShapeDtypeStruct((2, Hp), jnp.float32),
        ),
        in_specs=[vmem] * 9,
        out_specs=(vmem, vmem),
    )(state, pp["w1"], pp["b1"], pp["wih"], pp["whh"], pp["bg"],
      hc0, pp["w3"], pp["b3"])

    q = q_pad[:, :action_size].reshape(T, 1, action_size)
    new_hidden = (hc_new[0, :H].reshape(1, 1, H), hc_new[1, :H].reshape(1, 1, H))
    return q, new_hidden


def rq_forward_ref(state, params, h0, c0):
    """Pure-JAX f32 reference (mirrors PyTorch semantics) for validation."""
    x1 = jnp.maximum(state @ params["fc1_w"].T + params["fc1_b"], 0.0)   # (T, F)
    H = params["w_hh"].shape[1]
    h = h0.reshape(1, H)
    c = c0.reshape(1, H)
    hs = []
    for t in range(state.shape[0]):
        gates = (x1[t:t + 1] @ params["w_ih"].T + params["b_ih"]
                 + h @ params["w_hh"].T + params["b_hh"])
        i = jax.nn.sigmoid(gates[:, 0 * H:1 * H])
        f = jax.nn.sigmoid(gates[:, 1 * H:2 * H])
        g = jnp.tanh(gates[:, 2 * H:3 * H])
        o = jax.nn.sigmoid(gates[:, 3 * H:4 * H])
        c = f * c + i * g
        h = o * jnp.tanh(c)
        hs.append(h)
    hseq = jnp.concatenate(hs, axis=0)                                    # (T, H)
    q = hseq @ params["fc3_w"].T + params["fc3_b"]
    return q.reshape(state.shape[0], 1, -1), (h.reshape(1, 1, H), c.reshape(1, 1, H))


if __name__ == "__main__":
    state_size = 16
    action_size = 4
    fc1_units = 64
    hidden_size = 64
    T = 8  # sequence length (update_hidden=False path allows T > 1)

    key = jax.random.PRNGKey(0)
    k_param, k_state = jax.random.split(key)
    params, (h0, c0) = init_params(k_param, state_size, action_size,
                                   fc1_units, hidden_size)
    state = jax.random.normal(k_state, (T, state_size), jnp.float32)

    # One-time weight prep (transpose / bias fold / 128-lane pad / bf16) kept out of
    # the per-call jitted path.
    pp = prepare_params(params)

    q, (hn, cn) = rq_forward(state, pp, h0, c0, action_size=action_size)
    jax.block_until_ready((q, hn, cn))

    q_ref, (hn_ref, cn_ref) = rq_forward_ref(state, params, h0, c0)
    assert q.shape == (T, 1, action_size)
    # bf16 matmul operands -> looser tolerance than the pure-f32 version.
    assert jnp.allclose(q, q_ref, atol=2e-2, rtol=2e-2), "q mismatch vs reference"
    assert jnp.allclose(hn, hn_ref, atol=2e-2, rtol=2e-2), "h_n mismatch vs reference"
    assert jnp.allclose(cn, cn_ref, atol=2e-2, rtol=2e-2), "c_n mismatch vs reference"

    print("KERNEL_OK")
</pallas_src>

<mosaic_0001>
module attributes {stable_mosaic.version = 11 : i64} {
  func.func @rq_kernel(%arg0: memref<8x16xf32, #tpu.memory_space<vmem>>, %arg1: memref<16x128xbf16, #tpu.memory_space<vmem>>, %arg2: memref<1x128xf32, #tpu.memory_space<vmem>>, %arg3: memref<128x512xbf16, #tpu.memory_space<vmem>>, %arg4: memref<128x512xbf16, #tpu.memory_space<vmem>>, %arg5: memref<1x512xf32, #tpu.memory_space<vmem>>, %arg6: memref<2x128xf32, #tpu.memory_space<vmem>>, %arg7: memref<128x128xbf16, #tpu.memory_space<vmem>>, %arg8: memref<1x128xf32, #tpu.memory_space<vmem>>, %arg9: memref<8x128xf32, #tpu.memory_space<vmem>>, %arg10: memref<2x128xf32, #tpu.memory_space<vmem>>) attributes {dimension_semantics = [], scalar_prefetch = 0 : i64, scratch_operands = 0 : i64, tpu.core_type = #tpu.core_type<tc>} {
    %c0 = arith.constant 0 : index
    %c0_0 = arith.constant 0 : index
    %0 = vector.load %arg0[%c0, %c0_0] : memref<8x16xf32, #tpu.memory_space<vmem>>, vector<8x16xf32>
    %1 = arith.truncf %0 : vector<8x16xf32> to vector<8x16xbf16>
    %c0_1 = arith.constant 0 : index
    %c0_2 = arith.constant 0 : index
    %2 = vector.load %arg1[%c0_1, %c0_2] : memref<16x128xbf16, #tpu.memory_space<vmem>>, vector<16x128xbf16>
    %cst = arith.constant dense<0.000000e+00> : vector<8x128xf32>
    %3 = tpu.matmul %1, %2, %cst {dimension_numbers = #tpu.dot_dimension_numbers<[1], [0], [0], [1], [0, 0, 1, 1], [], []>} : vector<8x16xbf16>, vector<16x128xbf16>, vector<8x128xf32> -> vector<8x128xf32>
    %c0_3 = arith.constant 0 : index
    %c0_4 = arith.constant 0 : index
    %4 = vector.load %arg2[%c0_3, %c0_4] : memref<1x128xf32, #tpu.memory_space<vmem>>, vector<1x128xf32>
    %5 = vector.broadcast %4 : vector<1x128xf32> to vector<8x128xf32>
    %6 = arith.addf %3, %5 : vector<8x128xf32>
    %cst_5 = arith.constant 0.000000e+00 : f32
    %7 = vector.broadcast %cst_5 : f32 to vector<8x128xf32>
    %8 = arith.maximumf %6, %7 : vector<8x128xf32>
    %9 = arith.truncf %8 : vector<8x128xf32> to vector<8x128xbf16>
    %c0_6 = arith.constant 0 : index
    %c0_7 = arith.constant 0 : index
    %10 = vector.load %arg3[%c0_6, %c0_7] : memref<128x512xbf16, #tpu.memory_space<vmem>>, vector<128x512xbf16>
    %cst_8 = arith.constant dense<0.000000e+00> : vector<8x512xf32>
    %11 = tpu.matmul %9, %10, %cst_8 {dimension_numbers = #tpu.dot_dimension_numbers<[1], [0], [0], [1], [0, 0, 1, 1], [], []>} : vector<8x128xbf16>, vector<128x512xbf16>, vector<8x512xf32> -> vector<8x512xf32>
    %c0_9 = arith.constant 0 : index
    %c0_10 = arith.constant 0 : index
    %12 = vector.load %arg5[%c0_9, %c0_10] : memref<1x512xf32, #tpu.memory_space<vmem>>, vector<1x512xf32>
    %13 = vector.broadcast %12 : vector<1x512xf32> to vector<8x512xf32>
    %14 = arith.addf %11, %13 : vector<8x512xf32>
    %c0_11 = arith.constant 0 : index
    %c0_12 = arith.constant 0 : index
    %15 = vector.load %arg6[%c0_11, %c0_12] : memref<2x128xf32, #tpu.memory_space<vmem>>, vector<1x128xf32>
    %c1 = arith.constant 1 : index
    %c0_13 = arith.constant 0 : index
    %16 = vector.load %arg6[%c1, %c0_13] : memref<2x128xf32, #tpu.memory_space<vmem>>, vector<1x128xf32>
    %17 = vector.extract_strided_slice %14 {offsets = [0, 0], sizes = [1, 512], strides = [1, 1]} : vector<8x512xf32> to vector<1x512xf32>
    %18 = arith.truncf %15 : vector<1x128xf32> to vector<1x128xbf16>
    %c0_14 = arith.constant 0 : index
    %c0_15 = arith.constant 0 : index
    %19 = vector.load %arg4[%c0_14, %c0_15] : memref<128x512xbf16, #tpu.memory_space<vmem>>, vector<128x512xbf16>
    %cst_16 = arith.constant dense<0.000000e+00> : vector<1x512xf32>
    %20 = tpu.matmul %18, %19, %cst_16 {dimension_numbers = #tpu.dot_dimension_numbers<[1], [0], [0], [1], [0, 0, 1, 1], [], []>} : vector<1x128xbf16>, vector<128x512xbf16>, vector<1x512xf32> -> vector<1x512xf32>
    %21 = arith.addf %17, %20 : vector<1x512xf32>
    %22 = vector.extract_strided_slice %21 {offsets = [0, 0], sizes = [1, 128], strides = [1, 1]} : vector<1x512xf32> to vector<1x128xf32>
    %23 = arith.negf %22 : vector<1x128xf32>
    %24 = math.exp %23 : vector<1x128xf32>
    %cst_17 = arith.constant 1.000000e+00 : f32
    %25 = vector.broadcast %cst_17 : f32 to vector<1x128xf32>
    %26 = arith.addf %25, %24 : vector<1x128xf32>
    %27 = arith.divf %25, %26 : vector<1x128xf32>
    %28 = vector.extract_strided_slice %21 {offsets = [0, 128], sizes = [1, 128], strides = [1, 1]} : vector<1x512xf32> to vector<1x128xf32>
    %29 = arith.negf %28 : vector<1x128xf32>
    %30 = math.exp %29 : vector<1x128xf32>
    %cst_18 = arith.constant 1.000000e+00 : f32
    %31 = vector.broadcast %cst_18 : f32 to vector<1x128xf32>
    %32 = arith.addf %31, %30 : vector<1x128xf32>
    %33 = arith.divf %31, %32 : vector<1x128xf32>
    %34 = vector.extract_strided_slice %21 {offsets = [0, 256], sizes = [1, 128], strides = [1, 1]} : vector<1x512xf32> to vector<1x128xf32>
    %35 = math.tanh %34 : vector<1x128xf32>
    %36 = vector.extract_strided_slice %21 {offsets = [0, 384], sizes = [1, 128], strides = [1, 1]} : vector<1x512xf32> to vector<1x128xf32>
    %37 = arith.negf %36 : vector<1x128xf32>
    %38 = math.exp %37 : vector<1x128xf32>
    %cst_19 = arith.constant 1.000000e+00 : f32
    %39 = vector.broadcast %cst_19 : f32 to vector<1x128xf32>
    %40 = arith.addf %39, %38 : vector<1x128xf32>
    %41 = arith.divf %39, %40 : vector<1x128xf32>
    %42 = arith.mulf %33, %16 : vector<1x128xf32>
    %43 = arith.mulf %27, %35 : vector<1x128xf32>
    %44 = arith.addf %42, %43 : vector<1x128xf32>
    %45 = math.tanh %44 : vector<1x128xf32>
    %46 = arith.mulf %41, %45 : vector<1x128xf32>
    %47 = vector.extract_strided_slice %14 {offsets = [1, 0], sizes = [1, 512], strides = [1, 1]} : vector<8x512xf32> to vector<1x512xf32>
    %48 = arith.truncf %46 : vector<1x128xf32> to vector<1x128xbf16>
    %c0_20 = arith.constant 0 : index
    %c0_21 = arith.constant 0 : index
    %49 = vector.load %arg4[%c0_20, %c0_21] : memref<128x512xbf16, #tpu.memory_space<vmem>>, vector<128x512xbf16>
    %cst_22 = arith.constant dense<0.000000e+00> : vector<1x512xf32>
    %50 = tpu.matmul %48, %49, %cst_22 {dimension_numbers = #tpu.dot_dimension_numbers<[1], [0], [0], [1], [0, 0, 1, 1], [], []>} : vector<1x128xbf16>, vector<128x512xbf16>, vector<1x512xf32> -> vector<1x512xf32>
    %51 = arith.addf %47, %50 : vector<1x512xf32>
    %52 = vector.extract_strided_slice %51 {offsets = [0, 0], sizes = [1, 128], strides = [1, 1]} : vector<1x512xf32> to vector<1x128xf32>
    %53 = arith.negf %52 : vector<1x128xf32>
    %54 = math.exp %53 : vector<1x128xf32>
    %cst_23 = arith.constant 1.000000e+00 : f32
    %55 = vector.broadcast %cst_23 : f32 to vector<1x128xf32>
    %56 = arith.addf %55, %54 : vector<1x128xf32>
    %57 = arith.divf %55, %56 : vector<1x128xf32>
    %58 = vector.extract_strided_slice %51 {offsets = [0, 128], sizes = [1, 128], strides = [1, 1]} : vector<1x512xf32> to vector<1x128xf32>
    %59 = arith.negf %58 : vector<1x128xf32>
    %60 = math.exp %59 : vector<1x128xf32>
    %cst_24 = arith.constant 1.000000e+00 : f32
    %61 = vector.broadcast %cst_24 : f32 to vector<1x128xf32>
    %62 = arith.addf %61, %60 : vector<1x128xf32>
    %63 = arith.divf %61, %62 : vector<1x128xf32>
    %64 = vector.extract_strided_slice %51 {offsets = [0, 256], sizes = [1, 128], strides = [1, 1]} : vector<1x512xf32> to vector<1x128xf32>
    %65 = math.tanh %64 : vector<1x128xf32>
    %66 = vector.extract_strided_slice %51 {offsets = [0, 384], sizes = [1, 128], strides = [1, 1]} : vector<1x512xf32> to vector<1x128xf32>
    %67 = arith.negf %66 : vector<1x128xf32>
    %68 = math.exp %67 : vector<1x128xf32>
    %cst_25 = arith.constant 1.000000e+00 : f32
    %69 = vector.broadcast %cst_25 : f32 to vector<1x128xf32>
    %70 = arith.addf %69, %68 : vector<1x128xf32>
    %71 = arith.divf %69, %70 : vector<1x128xf32>
    %72 = arith.mulf %63, %44 : vector<1x128xf32>
    %73 = arith.mulf %57, %65 : vector<1x128xf32>
    %74 = arith.addf %72, %73 : vector<1x128xf32>
    %75 = math.tanh %74 : vector<1x128xf32>
    %76 = arith.mulf %71, %75 : vector<1x128xf32>
    %77 = vector.extract_strided_slice %14 {offsets = [2, 0], sizes = [1, 512], strides = [1, 1]} : vector<8x512xf32> to vector<1x512xf32>
    %78 = arith.truncf %76 : vector<1x128xf32> to vector<1x128xbf16>
    %c0_26 = arith.constant 0 : index
    %c0_27 = arith.constant 0 : index
    %79 = vector.load %arg4[%c0_26, %c0_27] : memref<128x512xbf16, #tpu.memory_space<vmem>>, vector<128x512xbf16>
    %cst_28 = arith.constant dense<0.000000e+00> : vector<1x512xf32>
    %80 = tpu.matmul %78, %79, %cst_28 {dimension_numbers = #tpu.dot_dimension_numbers<[1], [0], [0], [1], [0, 0, 1, 1], [], []>} : vector<1x128xbf16>, vector<128x512xbf16>, vector<1x512xf32> -> vector<1x512xf32>
    %81 = arith.addf %77, %80 : vector<1x512xf32>
    %82 = vector.extract_strided_slice %81 {offsets = [0, 0], sizes = [1, 128], strides = [1, 1]} : vector<1x512xf32> to vector<1x128xf32>
    %83 = arith.negf %82 : vector<1x128xf32>
    %84 = math.exp %83 : vector<1x128xf32>
    %cst_29 = arith.constant 1.000000e+00 : f32
    %85 = vector.broadcast %cst_29 : f32 to vector<1x128xf32>
    %86 = arith.addf %85, %84 : vector<1x128xf32>
    %87 = arith.divf %85, %86 : vector<1x128xf32>
    %88 = vector.extract_strided_slice %81 {offsets = [0, 128], sizes = [1, 128], strides = [1, 1]} : vector<1x512xf32> to vector<1x128xf32>
    %89 = arith.negf %88 : vector<1x128xf32>
    %90 = math.exp %89 : vector<1x128xf32>
    %cst_30 = arith.constant 1.000000e+00 : f32
    %91 = vector.broadcast %cst_30 : f32 to vector<1x128xf32>
    %92 = arith.addf %91, %90 : vector<1x128xf32>
    %93 = arith.divf %91, %92 : vector<1x128xf32>
    %94 = vector.extract_strided_slice %81 {offsets = [0, 256], sizes = [1, 128], strides = [1, 1]} : vector<1x512xf32> to vector<1x128xf32>
    %95 = math.tanh %94 : vector<1x128xf32>
    %96 = vector.extract_strided_slice %81 {offsets = [0, 384], sizes = [1, 128], strides = [1, 1]} : vector<1x512xf32> to vector<1x128xf32>
    %97 = arith.negf %96 : vector<1x128xf32>
    %98 = math.exp %97 : vector<1x128xf32>
    %cst_31 = arith.constant 1.000000e+00 : f32
    %99 = vector.broadcast %cst_31 : f32 to vector<1x128xf32>
    %100 = arith.addf %99, %98 : vector<1x128xf32>
    %101 = arith.divf %99, %100 : vector<1x128xf32>
    %102 = arith.mulf %93, %74 : vector<1x128xf32>
    %103 = arith.mulf %87, %95 : vector<1x128xf32>
    %104 = arith.addf %102, %103 : vector<1x128xf32>
    %105 = math.tanh %104 : vector<1x128xf32>
    %106 = arith.mulf %101, %105 : vector<1x128xf32>
    %107 = vector.extract_strided_slice %14 {offsets = [3, 0], sizes = [1, 512], strides = [1, 1]} : vector<8x512xf32> to vector<1x512xf32>
    %108 = arith.truncf %106 : vector<1x128xf32> to vector<1x128xbf16>
    %c0_32 = arith.constant 0 : index
    %c0_33 = arith.constant 0 : index
    %109 = vector.load %arg4[%c0_32, %c0_33] : memref<128x512xbf16, #tpu.memory_space<vmem>>, vector<128x512xbf16>
    %cst_34 = arith.constant dense<0.000000e+00> : vector<1x512xf32>
    %110 = tpu.matmul %108, %109, %cst_34 {dimension_numbers = #tpu.dot_dimension_numbers<[1], [0], [0], [1], [0, 0, 1, 1], [], []>} : vector<1x128xbf16>, vector<128x512xbf16>, vector<1x512xf32> -> vector<1x512xf32>
    %111 = arith.addf %107, %110 : vector<1x512xf32>
    %112 = vector.extract_strided_slice %111 {offsets = [0, 0], sizes = [1, 128], strides = [1, 1]} : vector<1x512xf32> to vector<1x128xf32>
    %113 = arith.negf %112 : vector<1x128xf32>
    %114 = math.exp %113 : vector<1x128xf32>
    %cst_35 = arith.constant 1.000000e+00 : f32
    %115 = vector.broadcast %cst_35 : f32 to vector<1x128xf32>
    %116 = arith.addf %115, %114 : vector<1x128xf32>
    %117 = arith.divf %115, %116 : vector<1x128xf32>
    %118 = vector.extract_strided_slice %111 {offsets = [0, 128], sizes = [1, 128], strides = [1, 1]} : vector<1x512xf32> to vector<1x128xf32>
    %119 = arith.negf %118 : vector<1x128xf32>
    %120 = math.exp %119 : vector<1x128xf32>
    %cst_36 = arith.constant 1.000000e+00 : f32
    %121 = vector.broadcast %cst_36 : f32 to vector<1x128xf32>
    %122 = arith.addf %121, %120 : vector<1x128xf32>
    %123 = arith.divf %121, %122 : vector<1x128xf32>
    %124 = vector.extract_strided_slice %111 {offsets = [0, 256], sizes = [1, 128], strides = [1, 1]} : vector<1x512xf32> to vector<1x128xf32>
    %125 = math.tanh %124 : vector<1x128xf32>
    %126 = vector.extract_strided_slice %111 {offsets = [0, 384], sizes = [1, 128], strides = [1, 1]} : vector<1x512xf32> to vector<1x128xf32>
    %127 = arith.negf %126 : vector<1x128xf32>
    %128 = math.exp %127 : vector<1x128xf32>
    %cst_37 = arith.constant 1.000000e+00 : f32
    %129 = vector.broadcast %cst_37 : f32 to vector<1x128xf32>
    %130 = arith.addf %129, %128 : vector<1x128xf32>
    %131 = arith.divf %129, %130 : vector<1x128xf32>
    %132 = arith.mulf %123, %104 : vector<1x128xf32>
    %133 = arith.mulf %117, %125 : vector<1x128xf32>
    %134 = arith.addf %132, %133 : vector<1x128xf32>
    %135 = math.tanh %134 : vector<1x128xf32>
    %136 = arith.mulf %131, %135 : vector<1x128xf32>
    %137 = vector.extract_strided_slice %14 {offsets = [4, 0], sizes = [1, 512], strides = [1, 1]} : vector<8x512xf32> to vector<1x512xf32>
    %138 = arith.truncf %136 : vector<1x128xf32> to vector<1x128xbf16>
    %c0_38 = arith.constant 0 : index
    %c0_39 = arith.constant 0 : index
    %139 = vector.load %arg4[%c0_38, %c0_39] : memref<128x512xbf16, #tpu.memory_space<vmem>>, vector<128x512xbf16>
    %cst_40 = arith.constant dense<0.000000e+00> : vector<1x512xf32>
    %140 = tpu.matmul %138, %139, %cst_40 {dimension_numbers = #tpu.dot_dimension_numbers<[1], [0], [0], [1], [0, 0, 1, 1], [], []>} : vector<1x128xbf16>, vector<128x512xbf16>, vector<1x512xf32> -> vector<1x512xf32>
    %141 = arith.addf %137, %140 : vector<1x512xf32>
    %142 = vector.extract_strided_slice %141 {offsets = [0, 0], sizes = [1, 128], strides = [1, 1]} : vector<1x512xf32> to vector<1x128xf32>
    %143 = arith.negf %142 : vector<1x128xf32>
    %144 = math.exp %143 : vector<1x128xf32>
    %cst_41 = arith.constant 1.000000e+00 : f32
    %145 = vector.broadcast %cst_41 : f32 to vector<1x128xf32>
    %146 = arith.addf %145, %144 : vector<1x128xf32>
    %147 = arith.divf %145, %146 : vector<1x128xf32>
    %148 = vector.extract_strided_slice %141 {offsets = [0, 128], sizes = [1, 128], strides = [1, 1]} : vector<1x512xf32> to vector<1x128xf32>
    %149 = arith.negf %148 : vector<1x128xf32>
    %150 = math.exp %149 : vector<1x128xf32>
    %cst_42 = arith.constant 1.000000e+00 : f32
    %151 = vector.broadcast %cst_42 : f32 to vector<1x128xf32>
    %152 = arith.addf %151, %150 : vector<1x128xf32>
    %153 = arith.divf %151, %152 : vector<1x128xf32>
    %154 = vector.extract_strided_slice %141 {offsets = [0, 256], sizes = [1, 128], strides = [1, 1]} : vector<1x512xf32> to vector<1x128xf32>
    %155 = math.tanh %154 : vector<1x128xf32>
    %156 = vector.extract_strided_slice %141 {offsets = [0, 384], sizes = [1, 128], strides = [1, 1]} : vector<1x512xf32> to vector<1x128xf32>
    %157 = arith.negf %156 : vector<1x128xf32>
    %158 = math.exp %157 : vector<1x128xf32>
    %cst_43 = arith.constant 1.000000e+00 : f32
    %159 = vector.broadcast %cst_43 : f32 to vector<1x128xf32>
    %160 = arith.addf %159, %158 : vector<1x128xf32>
    %161 = arith.divf %159, %160 : vector<1x128xf32>
    %162 = arith.mulf %153, %134 : vector<1x128xf32>
    %163 = arith.mulf %147, %155 : vector<1x128xf32>
    %164 = arith.addf %162, %163 : vector<1x128xf32>
    %165 = math.tanh %164 : vector<1x128xf32>
    %166 = arith.mulf %161, %165 : vector<1x128xf32>
    %167 = vector.extract_strided_slice %14 {offsets = [5, 0], sizes = [1, 512], strides = [1, 1]} : vector<8x512xf32> to vector<1x512xf32>
    %168 = arith.truncf %166 : vector<1x128xf32> to vector<1x128xbf16>
    %c0_44 = arith.constant 0 : index
    %c0_45 = arith.constant 0 : index
    %169 = vector.load %arg4[%c0_44, %c0_45] : memref<128x512xbf16, #tpu.memory_space<vmem>>, vector<128x512xbf16>
    %cst_46 = arith.constant dense<0.000000e+00> : vector<1x512xf32>
    %170 = tpu.matmul %168, %169, %cst_46 {dimension_numbers = #tpu.dot_dimension_numbers<[1], [0], [0], [1], [0, 0, 1, 1], [], []>} : vector<1x128xbf16>, vector<128x512xbf16>, vector<1x512xf32> -> vector<1x512xf32>
    %171 = arith.addf %167, %170 : vector<1x512xf32>
    %172 = vector.extract_strided_slice %171 {offsets = [0, 0], sizes = [1, 128], strides = [1, 1]} : vector<1x512xf32> to vector<1x128xf32>
    %173 = arith.negf %172 : vector<1x128xf32>
    %174 = math.exp %173 : vector<1x128xf32>
    %cst_47 = arith.constant 1.000000e+00 : f32
    %175 = vector.broadcast %cst_47 : f32 to vector<1x128xf32>
    %176 = arith.addf %175, %174 : vector<1x128xf32>
    %177 = arith.divf %175, %176 : vector<1x128xf32>
    %178 = vector.extract_strided_slice %171 {offsets = [0, 128], sizes = [1, 128], strides = [1, 1]} : vector<1x512xf32> to vector<1x128xf32>
    %179 = arith.negf %178 : vector<1x128xf32>
    %180 = math.exp %179 : vector<1x128xf32>
    %cst_48 = arith.constant 1.000000e+00 : f32
    %181 = vector.broadcast %cst_48 : f32 to vector<1x128xf32>
    %182 = arith.addf %181, %180 : vector<1x128xf32>
    %183 = arith.divf %181, %182 : vector<1x128xf32>
    %184 = vector.extract_strided_slice %171 {offsets = [0, 256], sizes = [1, 128], strides = [1, 1]} : vector<1x512xf32> to vector<1x128xf32>
    %185 = math.tanh %184 : vector<1x128xf32>
    %186 = vector.extract_strided_slice %171 {offsets = [0, 384], sizes = [1, 128], strides = [1, 1]} : vector<1x512xf32> to vector<1x128xf32>
    %187 = arith.negf %186 : vector<1x128xf32>
    %188 = math.exp %187 : vector<1x128xf32>
    %cst_49 = arith.constant 1.000000e+00 : f32
    %189 = vector.broadcast %cst_49 : f32 to vector<1x128xf32>
    %190 = arith.addf %189, %188 : vector<1x128xf32>
    %191 = arith.divf %189, %190 : vector<1x128xf32>
    %192 = arith.mulf %183, %164 : vector<1x128xf32>
    %193 = arith.mulf %177, %185 : vector<1x128xf32>
    %194 = arith.addf %192, %193 : vector<1x128xf32>
    %195 = math.tanh %194 : vector<1x128xf32>
    %196 = arith.mulf %191, %195 : vector<1x128xf32>
    %197 = vector.extract_strided_slice %14 {offsets = [6, 0], sizes = [1, 512], strides = [1, 1]} : vector<8x512xf32> to vector<1x512xf32>
    %198 = arith.truncf %196 : vector<1x128xf32> to vector<1x128xbf16>
    %c0_50 = arith.constant 0 : index
    %c0_51 = arith.constant 0 : index
    %199 = vector.load %arg4[%c0_50, %c0_51] : memref<128x512xbf16, #tpu.memory_space<vmem>>, vector<128x512xbf16>
    %cst_52 = arith.constant dense<0.000000e+00> : vector<1x512xf32>
    %200 = tpu.matmul %198, %199, %cst_52 {dimension_numbers = #tpu.dot_dimension_numbers<[1], [0], [0], [1], [0, 0, 1, 1], [], []>} : vector<1x128xbf16>, vector<128x512xbf16>, vector<1x512xf32> -> vector<1x512xf32>
    %201 = arith.addf %197, %200 : vector<1x512xf32>
    %202 = vector.extract_strided_slice %201 {offsets = [0, 0], sizes = [1, 128], strides = [1, 1]} : vector<1x512xf32> to vector<1x128xf32>
    %203 = arith.negf %202 : vector<1x128xf32>
    %204 = math.exp %203 : vector<1x128xf32>
    %cst_53 = arith.constant 1.000000e+00 : f32
    %205 = vector.broadcast %cst_53 : f32 to vector<1x128xf32>
    %206 = arith.addf %205, %204 : vector<1x128xf32>
    %207 = arith.divf %205, %206 : vector<1x128xf32>
    %208 = vector.extract_strided_slice %201 {offsets = [0, 128], sizes = [1, 128], strides = [1, 1]} : vector<1x512xf32> to vector<1x128xf32>
    %209 = arith.negf %208 : vector<1x128xf32>
    %210 = math.exp %209 : vector<1x128xf32>
    %cst_54 = arith.constant 1.000000e+00 : f32
    %211 = vector.broadcast %cst_54 : f32 to vector<1x128xf32>
    %212 = arith.addf %211, %210 : vector<1x128xf32>
    %213 = arith.divf %211, %212 : vector<1x128xf32>
    %214 = vector.extract_strided_slice %201 {offsets = [0, 256], sizes = [1, 128], strides = [1, 1]} : vector<1x512xf32> to vector<1x128xf32>
    %215 = math.tanh %214 : vector<1x128xf32>
    %216 = vector.extract_strided_slice %201 {offsets = [0, 384], sizes = [1, 128], strides = [1, 1]} : vector<1x512xf32> to vector<1x128xf32>
    %217 = arith.negf %216 : vector<1x128xf32>
    %218 = math.exp %217 : vector<1x128xf32>
    %cst_55 = arith.constant 1.000000e+00 : f32
    %219 = vector.broadcast %cst_55 : f32 to vector<1x128xf32>
    %220 = arith.addf %219, %218 : vector<1x128xf32>
    %221 = arith.divf %219, %220 : vector<1x128xf32>
    %222 = arith.mulf %213, %194 : vector<1x128xf32>
    %223 = arith.mulf %207, %215 : vector<1x128xf32>
    %224 = arith.addf %222, %223 : vector<1x128xf32>
    %225 = math.tanh %224 : vector<1x128xf32>
    %226 = arith.mulf %221, %225 : vector<1x128xf32>
    %227 = vector.extract_strided_slice %14 {offsets = [7, 0], sizes = [1, 512], strides = [1, 1]} : vector<8x512xf32> to vector<1x512xf32>
    %228 = arith.truncf %226 : vector<1x128xf32> to vector<1x128xbf16>
    %c0_56 = arith.constant 0 : index
    %c0_57 = arith.constant 0 : index
    %229 = vector.load %arg4[%c0_56, %c0_57] : memref<128x512xbf16, #tpu.memory_space<vmem>>, vector<128x512xbf16>
    %cst_58 = arith.constant dense<0.000000e+00> : vector<1x512xf32>
    %230 = tpu.matmul %228, %229, %cst_58 {dimension_numbers = #tpu.dot_dimension_numbers<[1], [0], [0], [1], [0, 0, 1, 1], [], []>} : vector<1x128xbf16>, vector<128x512xbf16>, vector<1x512xf32> -> vector<1x512xf32>
    %231 = arith.addf %227, %230 : vector<1x512xf32>
    %232 = vector.extract_strided_slice %231 {offsets = [0, 0], sizes = [1, 128], strides = [1, 1]} : vector<1x512xf32> to vector<1x128xf32>
    %233 = arith.negf %232 : vector<1x128xf32>
    %234 = math.exp %233 : vector<1x128xf32>
    %cst_59 = arith.constant 1.000000e+00 : f32
    %235 = vector.broadcast %cst_59 : f32 to vector<1x128xf32>
    %236 = arith.addf %235, %234 : vector<1x128xf32>
    %237 = arith.divf %235, %236 : vector<1x128xf32>
    %238 = vector.extract_strided_slice %231 {offsets = [0, 128], sizes = [1, 128], strides = [1, 1]} : vector<1x512xf32> to vector<1x128xf32>
    %239 = arith.negf %238 : vector<1x128xf32>
    %240 = math.exp %239 : vector<1x128xf32>
    %cst_60 = arith.constant 1.000000e+00 : f32
    %241 = vector.broadcast %cst_60 : f32 to vector<1x128xf32>
    %242 = arith.addf %241, %240 : vector<1x128xf32>
    %243 = arith.divf %241, %242 : vector<1x128xf32>
    %244 = vector.extract_strided_slice %231 {offsets = [0, 256], sizes = [1, 128], strides = [1, 1]} : vector<1x512xf32> to vector<1x128xf32>
    %245 = math.tanh %244 : vector<1x128xf32>
    %246 = vector.extract_strided_slice %231 {offsets = [0, 384], sizes = [1, 128], strides = [1, 1]} : vector<1x512xf32> to vector<1x128xf32>
    %247 = arith.negf %246 : vector<1x128xf32>
    %248 = math.exp %247 : vector<1x128xf32>
    %cst_61 = arith.constant 1.000000e+00 : f32
    %249 = vector.broadcast %cst_61 : f32 to vector<1x128xf32>
    %250 = arith.addf %249, %248 : vector<1x128xf32>
    %251 = arith.divf %249, %250 : vector<1x128xf32>
    %252 = arith.mulf %243, %224 : vector<1x128xf32>
    %253 = arith.mulf %237, %245 : vector<1x128xf32>
    %254 = arith.addf %252, %253 : vector<1x128xf32>
    %255 = math.tanh %254 : vector<1x128xf32>
    %256 = arith.mulf %251, %255 : vector<1x128xf32>
    %257 = tpu.concatenate %256, %254 in 0 : vector<1x128xf32>, vector<1x128xf32> -> vector<2x128xf32>
    %c0_62 = arith.constant 0 : index
    %c0_63 = arith.constant 0 : index
    %258 = vector.load %arg10[%c0_62, %c0_63] : memref<2x128xf32, #tpu.memory_space<vmem>>, vector<2x128xf32>
    tpu.vector_store %arg10[%c0_62, %c0_63], %257 {strides = array<i32>} : memref<2x128xf32, #tpu.memory_space<vmem>>, vector<2x128xf32>,
    %259 = tpu.concatenate %46, %76, %106, %136, %166, %196, %226, %256 in 0 : vector<1x128xf32>, vector<1x128xf32>, vector<1x128xf32>, vector<1x128xf32>, vector<1x128xf32>, vector<1x128xf32>, vector<1x128xf32>, vector<1x128xf32> -> vector<8x128xf32>
    %260 = arith.truncf %259 : vector<8x128xf32> to vector<8x128xbf16>
    %c0_64 = arith.constant 0 : index
    %c0_65 = arith.constant 0 : index
    %261 = vector.load %arg7[%c0_64, %c0_65] : memref<128x128xbf16, #tpu.memory_space<vmem>>, vector<128x128xbf16>
    %cst_66 = arith.constant dense<0.000000e+00> : vector<8x128xf32>
    %262 = tpu.matmul %260, %261, %cst_66 {dimension_numbers = #tpu.dot_dimension_numbers<[1], [0], [0], [1], [0, 0, 1, 1], [], []>} : vector<8x128xbf16>, vector<128x128xbf16>, vector<8x128xf32> -> vector<8x128xf32>
    %c0_67 = arith.constant 0 : index
    %c0_68 = arith.constant 0 : index
    %263 = vector.load %arg8[%c0_67, %c0_68] : memref<1x128xf32, #tpu.memory_space<vmem>>, vector<1x128xf32>
    %264 = vector.broadcast %263 : vector<1x128xf32> to vector<8x128xf32>
    %265 = arith.addf %262, %264 : vector<8x128xf32>
    %c0_69 = arith.constant 0 : index
    %c0_70 = arith.constant 0 : index
    %266 = vector.load %arg9[%c0_69, %c0_70] : memref<8x128xf32, #tpu.memory_space<vmem>>, vector<8x128xf32>
    tpu.vector_store %arg9[%c0_69, %c0_70], %265 {strides = array<i32>} : memref<8x128xf32, #tpu.memory_space<vmem>>, vector<8x128xf32>,
    return
  }
}

</mosaic_0001>

<bundles_post_ra>
// kernel: rq_forward.1
= control target key start
LH: loop header
LB: loop body
LE: loop exit
PB: predicated region body
PF: predicated region fallthrough
CT: control target
= control target key end

     0   :  { %16 = vsyncpa [#allocation3], 0  ;;  %s2851_s0 = inlined_call_operand.vmem [shape: f32[8,16], index: 0, kind: input, shape index: {}]   ;;  %s2852_s1 = inlined_call_operand.vmem [shape: bf16[16,128], index: 1, kind: input, shape index: {}]   ;;  %s2853_s2 = inlined_call_operand.vmem [shape: f32[1,128], index: 2, kind: input, shape index: {}]   ;;  %s2854_s3 = inlined_call_operand.hbm [shape: bf16[128,512], index: 3, kind: input, shape index: {}]   ;;  %s2855_s4 = inlined_call_operand.hbm [shape: bf16[128,512], index: 4, kind: input, shape index: {}]   ;;  %s2856_s5 = inlined_call_operand.hbm [shape: f32[1,512], index: 5, kind: input, shape index: {}]   ;;  %s2857_s6 = inlined_call_operand.vmem [shape: f32[2,128], index: 6, kind: input, shape index: {}]   ;;  %s2858_s7 = inlined_call_operand.hbm [shape: bf16[128,128], index: 7, kind: input, shape index: {}]   ;;  %s2859_s8 = inlined_call_operand.hbm [shape: f32[1,128], index: 8, kind: input, shape index: {}]   ;;  %s2860_s9 = inlined_call_operand.vmem [shape: f32[8,128], index: 9, kind: output, shape index: {0}]   ;;  %s2861_s10 = inlined_call_operand.vmem [shape: f32[2,128], index: 10, kind: output, shape index: {1}]  }
   0x1   :  { %17 = vsyncpa [#allocation5], 0 }
   0x2   :  { %18 = vsyncpa [#allocation8], 0  ;;  %s2334_s13 = smov [#allocation4]   ;;  %s2335_s15 = smov [#allocation7]  }
   0x3   :  { %s42_s14 = sshll.u32 %s2334_s13, 4  ;;  %s66_s16 = sshll.u32 %s2335_s15, 4  ;;  %s43_s14 = int_to_ptr.vmem [resolvable:$true] %s42_s14  ;;  %s67_s16 = int_to_ptr.vmem [resolvable:$true] %s66_s16 }
   0x4   :  { %s2236_s17 = scalar_lea.vmem %s43_s14, 4096  ;;  %p2241_p1 = scmp.lt.s32.totalorder %s43_s14, %s43_s14 }
   0x5   :  { %p2237_p0 = scmp.ne.s32.totalorder %s43_s14, %s2236_s17  ;;  %p2242_p2 = scmp.lt.s32.totalorder %s2236_s17, %s2236_s17 }
   0x7   :  { %p2243_p3 = por %p2242_p2, %p2241_p1 }
   0x9   :  { %p2244_p4 = pnand %p2243_p3, %p2237_p0 }
   0xb   :  { %2247 = shalt.err (!%p2244_p4)
}
   0xc   :  { %s2336_s18 = smov 256   ;;  %s2337_s19 = smov 16  }
   0xd   :  { %48 = dma.hbm_to_vmem [thread:$0]  %s2855_s4, 4096, %s43_s14, [#allocation5], %s2336_s18, %s2336_s18, %s2337_s19  }
   0xe   :  { %s2256_s22 = scalar_lea.vmem %s67_s16, 1024  ;;  %p2261_p6 = scmp.lt.s32.totalorder %s67_s16, %s67_s16 }
   0xf   :  { %p2257_p5 = scmp.ne.s32.totalorder %s67_s16, %s2256_s22  ;;  %p2262_p7 = scmp.lt.s32.totalorder %s2256_s22, %s2256_s22 }
  0x11   :  { %p2263_p8 = por %p2262_p7, %p2261_p6 }
  0x13   :  { %p2264_p9 = pnand %p2263_p8, %p2257_p5 }
  0x15   :  { %2267 = shalt.err (!%p2264_p9)
}
  0x16   :  { %s2338_s23 = smov 64   ;;  %s2339_s24 = smov 4  }
  0x17   :  { %72 = dma.hbm_to_vmem [thread:$0]  %s2858_s7, 1024, %s67_s16, [#allocation8], %s2338_s23, %s2338_s23, %s2339_s24  }
  0x18   :  { %s2340_s27 = smov [#allocation2]   ;;  %s2341_s29 = smov [#allocation6]  }
  0x19   :  { %s30_s28 = sshll.u32 %s2340_s27, 4  ;;  %s55_s30 = sshll.u32 %s2341_s29, 4  ;;  %s31_s28 = int_to_ptr.vmem [resolvable:$true] %s30_s28  ;;  %s56_s30 = int_to_ptr.vmem [resolvable:$true] %s55_s30 }
  0x1a   :  { %s2276_s4 = scalar_lea.vmem %s31_s28, 4096  ;;  %p2281_p11 = scmp.lt.s32.totalorder %s31_s28, %s31_s28 }
  0x1b   :  { %p2277_p10 = scmp.ne.s32.totalorder %s31_s28, %s2276_s4  ;;  %p2282_p12 = scmp.lt.s32.totalorder %s2276_s4, %s2276_s4 }
  0x1d   :  { %p2283_p13 = por %p2282_p12, %p2281_p11 }
  0x1f   :  { %p2284_p0 = pnand %p2283_p13, %p2277_p10 }
  0x21   :  { %2287 = shalt.err (!%p2284_p0)
}
  0x22   :  { %36 = dma.hbm_to_vmem [thread:$0]  %s2854_s3, 4096, %s31_s28, [#allocation3], %s2336_s18, %s2336_s18, %s2337_s19  }
  0x23   :  { %s2296_s13 = scalar_lea.vmem %s56_s30, 64  ;;  %p2301_p2 = scmp.lt.s32.totalorder %s56_s30, %s56_s30 }
  0x24   :  { %p2297_p1 = scmp.ne.s32.totalorder %s56_s30, %s2296_s13  ;;  %p2302_p3 = scmp.lt.s32.totalorder %s2296_s13, %s2296_s13 }
  0x26   :  { %p2303_p4 = por %p2302_p3, %p2301_p2 }
  0x28   :  { %p2304_p5 = pnand %p2303_p4, %p2297_p1 }
  0x2a   :  { %2307 = shalt.err (!%p2304_p5)
}
  0x2b   :  { %58 = dma.hbm_to_vmem [thread:$0]  %s2856_s5, 64, %s56_s30, [#allocation5]  }
  0x2c   :  { %s2342_s15 = smov [#allocation9]  }
  0x2d   :  { %s79_s16 = sshll.u32 %s2342_s15, 4  ;;  %s80_s16 = int_to_ptr.vmem [resolvable:$true] %s79_s16 }
  0x2e   :  { %s2316_s17 = scalar_lea.vmem %s80_s16, 16  ;;  %s2320_s20 = scalar_lea.vmem %s80_s16, 32 }
  0x2f   :  { %p2317_p6 = scmp.ne.s32.totalorder %s80_s16, %s2316_s17  ;;  %p2321_p7 = scmp.lt.s32.totalorder %s80_s16, %s80_s16 }
  0x30   :  { %p2322_p8 = scmp.lt.s32.totalorder %s2320_s20, %s2316_s17 }
  0x32   :  { %p2323_p9 = por %p2322_p8, %p2321_p7 }
  0x34   :  { %p2324_p10 = pnand %p2323_p9, %p2317_p6 }
  0x36   :  { %2327 = shalt.err (!%p2324_p10)
}
  0x37   :  { %82 = dma.hbm_to_vmem [thread:$0]  %s2859_s8, 16, %s80_s16, [#allocation8]  }
  0x38   :  { %2328 = dma.done.wait [#allocation3], 4096  }
  0x39   :  { %2329 = vsyncadd [#allocation3], 4294963200 }
  0x3a   :  { %2330 = dma.done.wait [#allocation5], 4160  }
  0x3b   :  { %2331 = vsyncadd [#allocation5], 4294963136 }
  0x3c   :  { %2332 = dma.done.wait [#allocation8], 1040  }
  0x3d   :  { %2333 = vsyncadd [#allocation8], 4294966256  ;;  %v2343_v0 = vmov 0.0   ;;  %vm2344_vm0 = vmmov 0   ;;  %v1963_v1 = vld [vmem:[%s2852_s1] sm:$0xff]   ;;  %vm116_vm1 = vcmask 130048  }
  0x3e   :  { %1925 = vmatprep.subr.bf16.mxu0 %v2343_v0  ;;  %1927 = vmatprep.mubr.msk.bf16.mxu0 %vm2344_vm0, %v2343_v0  ;;  %v99_v2 = vld [vmem:[%s2851_s0] sm:$0xff]  ;;  %v1966_v5 = vld [vmem:[#allocation2 + $0xe8] ss:$16 sps:$4 sm:$0xff]   ;;  %v1968_v6 = vld [vmem:[#allocation2 + $0xec] ss:$16 sps:$4 sm:$0xff]   ;;  %v2345_v38 = vmov 0  }
  0x3f   :  { %1926 = vmatpush3.bf16.msra.mxu0 %v1963_v1  ;;  %v100_v3 = vpack.c.bf16 %v99_v2, %v99_v2  ;;  %v1964_v4 = vld [vmem:[#allocation2 + $0xe4] ss:$16 sps:$4 sm:$0xff]   ;;  %v1969_v7 = vld [vmem:[#allocation2 + $0xe0] ss:$16 sps:$4 sm:$0xff]   ;;  %v1972_v9 = vld [vmem:[#allocation2 + $0xc8] ss:$16 sps:$4 sm:$0xff]   ;;  %408 = vmatprep.mubr.bf16.mxu1 %v2345_v38 }
  0x40   :  { %376 = vmatprep.subr.bf16.mxu1 %v1964_v4  ;;  %v1970_v8 = vld [vmem:[#allocation2 + $0xc4] ss:$16 sps:$4 sm:$0xff]   ;;  %417 = vmatprep.subr.bf16.mxu0 %v1968_v6  ;;  %v1974_v10 = vld [vmem:[#allocation2 + $0xcc] ss:$16 sps:$4 sm:$0xff]   ;;  %v1975_v11 = vld [vmem:[#allocation2 + $0xc0] ss:$16 sps:$4 sm:$0xff]  }
  0x41   :  { %377 = vmatpush1.bf16.msra.mxu1 %v1969_v7  ;;  %v1976_v12 = vld [vmem:[#allocation2 + $0xa4] ss:$16 sps:$4 sm:$0xff]   ;;  %v1980_v13 = vld [vmem:[#allocation2 + $0xac] ss:$16 sps:$4 sm:$0xff]   ;;  %v1978_v14 = vld [vmem:[#allocation2 + $0xa8] ss:$16 sps:$4 sm:$0xff]  }
  0x42   :  { %1928 = vmatmul.mubr.msk.bf16.vlgmr.msra.gmra.mxu0 %vm116_vm1, %v100_v3  ;;  %378 = vmatprep.subr.bf16.mxu1 %v1970_v8  ;;  %v1981_v15 = vld [vmem:[#allocation2 + $0xa0] ss:$16 sps:$4 sm:$0xff]   ;;  %v1982_v16 = vld [vmem:[#allocation2 + $0x84] ss:$16 sps:$4 sm:$0xff]   ;;  %v1986_v17 = vld [vmem:[#allocation2 + $0x8c] ss:$16 sps:$4 sm:$0xff]  }
  0x43   :  { %418 = vmatpush1.bf16.msra.mxu0 %v1966_v5  ;;  %v1984_v18 = vld [vmem:[#allocation2 + $0x88] ss:$16 sps:$4 sm:$0xff]   ;;  %v1987_v19 = vld [vmem:[#allocation2 + $0x80] ss:$16 sps:$4 sm:$0xff]   ;;  %v1988_v20 = vld [vmem:[#allocation2 + $0x64] ss:$16 sps:$4 sm:$0xff]   ;;  %449 = vmatprep.mubr.bf16.mxu0 %v2345_v38 }
  0x44   :  { %419 = vmatprep.subr.bf16.mxu0 %v1974_v10  ;;  %v1992_v21 = vld [vmem:[#allocation2 + $0x6c] ss:$16 sps:$4 sm:$0xff]   ;;  %v1990_v22 = vld [vmem:[#allocation2 + $0x68] ss:$16 sps:$4 sm:$0xff]   ;;  %v1993_v23 = vld [vmem:[#allocation2 + $0x60] ss:$16 sps:$4 sm:$0xff]  }
  0x45   :  { %379 = vmatpush1.bf16.msra.mxu1 %v1975_v11  ;;  %v1994_v24 = vld [vmem:[#allocation2 + $0x44] ss:$16 sps:$4 sm:$0xff]   ;;  %v1998_v25 = vld [vmem:[#allocation2 + $0x4c] ss:$16 sps:$4 sm:$0xff]   ;;  %v1996_v26 = vld [vmem:[#allocation2 + $0x48] ss:$16 sps:$4 sm:$0xff]  }
  0x46   :  { %380 = vmatprep.subr.bf16.mxu1 %v1976_v12  ;;  %v1999_v27 = vld [vmem:[#allocation2 + $0x40] ss:$16 sps:$4 sm:$0xff]   ;;  %v2000_v28 = vld [vmem:[#allocation2 + $0x24] ss:$16 sps:$4 sm:$0xff]   ;;  %v2004_v29 = vld [vmem:[#allocation2 + $0x2c] ss:$16 sps:$4 sm:$0xff]  }
  0x47   :  { %420 = vmatpush1.bf16.msra.mxu0 %v1972_v9  ;;  %v2002_v30 = vld [vmem:[#allocation2 + $0x28] ss:$16 sps:$4 sm:$0xff]   ;;  %v2005_v31 = vld [vmem:[#allocation2 + $0x20] ss:$16 sps:$4 sm:$0xff]   ;;  %v2006_v32 = vld [vmem:[#allocation2 + $0x4] ss:$16 sps:$4 sm:$0xff]  }
  0x48   :  { %421 = vmatprep.subr.bf16.mxu0 %v1980_v13  ;;  %v2010_v33 = vld [vmem:[#allocation2 + $0xc] ss:$16 sps:$4 sm:$0xff]   ;;  %v2008_v34 = vld [vmem:[#allocation2 + $0x8] ss:$16 sps:$4 sm:$0xff]   ;;  %v2011_v35 = vld [vmem:[#allocation2] ss:$16 sps:$4 sm:$0xff]  }
  0x49   :  { %381 = vmatpush1.bf16.msra.mxu1 %v1981_v15  ;;  %v2425_v36 = vld [vmem:[#allocation4 + $0xe4] ss:$16 sps:$4 sm:$0xff]   ;;  %v2427_v37 = vld [vmem:[#allocation4 + $0xec] ss:$16 sps:$4 sm:$0xff]   ;;  %v1814_v39 = vld [vmem:[%s2853_s2] ss:$0 sm:$0xff] }
  0x4a   :  { %382 = vmatprep.subr.bf16.mxu1 %v1982_v16  ;;  %v2436_v45 = vld [vmem:[#allocation4 + $0xe0] ss:$16 sps:$4 sm:$0xff]   ;;  %v2438_v46 = vld [vmem:[#allocation4 + $0xe8] ss:$16 sps:$4 sm:$0xff]   ;;  %v2440_v48 = vld [vmem:[#allocation4 + $0xc4] ss:$16 sps:$4 sm:$0xff]  }
  0x4b   :  { %422 = vmatpush1.bf16.msra.mxu0 %v1978_v14  ;;  %v2442_v49 = vld [vmem:[#allocation4 + $0xcc] ss:$16 sps:$4 sm:$0xff]   ;;  %v2446_v51 = vld [vmem:[#allocation4 + $0xc0] ss:$16 sps:$4 sm:$0xff]   ;;  %v2448_v52 = vld [vmem:[#allocation4 + $0xc8] ss:$16 sps:$4 sm:$0xff]  }
  0x4c   :  { %423 = vmatprep.subr.bf16.mxu0 %v1986_v17  ;;  %v2452_v53 = vld [vmem:[#allocation4 + $0xa4] ss:$16 sps:$4 sm:$0xff]   ;;  %v2454_v54 = vld [vmem:[#allocation4 + $0xac] ss:$16 sps:$4 sm:$0xff]   ;;  %v2460_v55 = vld [vmem:[#allocation4 + $0xa0] ss:$16 sps:$4 sm:$0xff]  }
  0x4d   :  { %383 = vmatpush1.bf16.msra.mxu1 %v1987_v19  ;;  %v2462_v56 = vld [vmem:[#allocation4 + $0xa8] ss:$16 sps:$4 sm:$0xff]   ;;  %v2466_v57 = vld [vmem:[#allocation4 + $0x84] ss:$16 sps:$4 sm:$0xff]   ;;  %v2468_v58 = vld [vmem:[#allocation4 + $0x8c] ss:$16 sps:$4 sm:$0xff]  }
  0x4e   :  { %384 = vmatprep.subr.bf16.mxu1 %v1988_v20  ;;  %v2472_v59 = vld [vmem:[#allocation4 + $0x80] ss:$16 sps:$4 sm:$0xff]   ;;  %v2474_v60 = vld [vmem:[#allocation4 + $0x88] ss:$16 sps:$4 sm:$0xff]   ;;  %v2478_v61 = vld [vmem:[#allocation4 + $0x64] ss:$16 sps:$4 sm:$0xff]  }
  0x4f   :  { %424 = vmatpush1.bf16.msra.mxu0 %v1984_v18  ;;  %v2480_v62 = vld [vmem:[#allocation4 + $0x6c] ss:$16 sps:$4 sm:$0xff]   ;;  %v2484_v63 = vld [vmem:[#allocation4 + $0x60] ss:$16 sps:$4 sm:$0xff]   ;;  %v2486_v1 = vld [vmem:[#allocation4 + $0x68] ss:$16 sps:$4 sm:$0xff]  }
  0x50   :  { %425 = vmatprep.subr.bf16.mxu0 %v1992_v21  ;;  %v2490_v2 = vld [vmem:[#allocation4 + $0x44] ss:$16 sps:$4 sm:$0xff]   ;;  %v2492_v3 = vld [vmem:[#allocation4 + $0x4c] ss:$16 sps:$4 sm:$0xff]   ;;  %v2496_v4 = vld [vmem:[#allocation4 + $0x40] ss:$16 sps:$4 sm:$0xff]  }
  0x51   :  { %385 = vmatpush1.bf16.msra.mxu1 %v1993_v23  ;;  %v2498_v5 = vld [vmem:[#allocation4 + $0x48] ss:$16 sps:$4 sm:$0xff]   ;;  %v2502_v6 = vld [vmem:[#allocation4 + $0x24] ss:$16 sps:$4 sm:$0xff]   ;;  %v2504_v7 = vld [vmem:[#allocation4 + $0x2c] ss:$16 sps:$4 sm:$0xff]  }
  0x52   :  { %386 = vmatprep.subr.bf16.mxu1 %v1994_v24  ;;  %v2508_v8 = vld [vmem:[#allocation4 + $0x20] ss:$16 sps:$4 sm:$0xff]   ;;  %v2510_v9 = vld [vmem:[#allocation4 + $0x28] ss:$16 sps:$4 sm:$0xff]   ;;  %v2514_v10 = vld [vmem:[#allocation4 + $0x4] ss:$16 sps:$4 sm:$0xff]   ;;  %v196_v24 = vlaneseq }
  0x53   :  { %426 = vmatpush1.bf16.msra.mxu0 %v1990_v22  ;;  %v2516_v11 = vld [vmem:[#allocation4 + $0xc] ss:$16 sps:$4 sm:$0xff]   ;;  %v2520_v12 = vld [vmem:[#allocation4] ss:$16 sps:$4 sm:$0xff]   ;;  %v2522_v13 = vld [vmem:[#allocation4 + $0x8] ss:$16 sps:$4 sm:$0xff]  }
  0x54   :  { %427 = vmatprep.subr.bf16.mxu0 %v1998_v25  ;;  %v458_v14 = vld [vmem:[%s2857_s6] sm:$0x1]  ;;  %v197_v25 = vshrl.u32 %v196_v24, 7  ;;  %vm1674_vm2 = vcmask 1040384   ;;  %vm1678_vm3 = vcmask 1041408   ;;  %vm1680_vm4 = vcmask 1042432  }
  0x55   :  { %387 = vmatpush1.bf16.msra.mxu1 %v1999_v27  ;;  %v460_v15 = vpack.c.bf16 %v458_v14, %v458_v14  ;;  %v194_v27 = vld [vmem:[#allocation6] sm:$0xf]  ;;  %vm1682_vm5 = vcmask 1043456   ;;  %vm1684_vm6 = vcmask 1044480   ;;  %vm1686_vm7 = vcmask 1045504  }
  0x56   :  { %388 = vmatprep.subr.bf16.mxu1 %v2000_v28  ;;  %v202_v28 = vsub.s32 1, %v197_v25  ;;  %vm1688_vm8 = vcmask 1046528  }
  0x57   :  { %428 = vmatpush1.bf16.msra.mxu0 %v1996_v26  ;;  %v198_v26 = vsub.s32 0, %v197_v25 }
  0x58   :  { %429 = vmatprep.subr.bf16.mxu0 %v2004_v29 }
  0x59   :  { %389 = vmatpush1.bf16.msra.mxu1 %v2005_v31  ;;  %v199_v29 = vrot.slane %v194_v27, %v198_v26 }
  0x5a   :  { %390 = vmatprep.subr.bf16.mxu1 %v2006_v32 }
  0x5b   :  { %430 = vmatpush1.bf16.msra.mxu0 %v2002_v30  ;;  %v203_v30 = vrot.slane %v194_v27, %v202_v28 }
  0x5c   :  { %431 = vmatprep.subr.bf16.mxu0 %v2010_v33 }
  0x5d   :  { %391 = vmatpush1.bf16.msra.mxu1 %v2011_v35 }
  0x5e   :  { %653 = vmatprep.subr.bf16.mxu1 %v2425_v36 }
  0x5f   :  { %432 = vmatpush1.bf16.msra.mxu0 %v2008_v34 }
  0x60   :  { %694 = vmatprep.subr.bf16.mxu0 %v2427_v37 }
 0x102   :  { %v154_v40 = vpop.f32.mrf.mxu0 }
 0x103   :  { %v155_v41 = vadd.f32 %v1814_v39, %v154_v40  ;;  %v210_v39 = vsub.s32 3, %v197_v25 }
 0x104   :  { %v1929_v42 = vpop.f32.mrf.mxu0 }
 0x105   :  { %v160_v43 = vmax.f32 %v155_v41, 0.0  ;;  %v211_v14 = vrot.slane %v194_v27, %v210_v39 }
 0x106   :  { %v157_v44 = vpop.f32.mrf.mxu0 }
 0x107   :  { %v161_v47 = vpack.c.bf16 %v160_v43, %v160_v43 }
 0x108   :  { %v1930_v50 = vpop.f32.mrf.mxu0 }
 0x109   :  { %409 = vmatmul.mubr.bf16.vlgmr.msra.gmra.mxu1 %v161_v47  ;;  %450 = vmatmul.mubr.bf16.vlgmr.msra.gmra.mxu0 %v161_v47 }
 0x10a   :  { %654 = vmatpush1.bf16.msra.mxu1 %v2436_v45  ;;  %695 = vmatpush1.bf16.msra.mxu0 %v2438_v46 }
 0x10b   :  { %655 = vmatprep.subr.bf16.mxu1 %v2440_v48  ;;  %696 = vmatprep.subr.bf16.mxu0 %v2442_v49 }
 0x10c   :  { %685 = vmatprep.mubr.bf16.mxu1 %v2345_v38  ;;  %726 = vmatprep.mubr.bf16.mxu0 %v2345_v38 }
 0x10e   :  { %656 = vmatpush1.bf16.msra.mxu1 %v2446_v51  ;;  %697 = vmatpush1.bf16.msra.mxu0 %v2448_v52 }
 0x10f   :  { %657 = vmatprep.subr.bf16.mxu1 %v2452_v53  ;;  %698 = vmatprep.subr.bf16.mxu0 %v2454_v54 }
 0x112   :  { %658 = vmatpush1.bf16.msra.mxu1 %v2460_v55  ;;  %699 = vmatpush1.bf16.msra.mxu0 %v2462_v56 }
 0x113   :  { %659 = vmatprep.subr.bf16.mxu1 %v2466_v57  ;;  %700 = vmatprep.subr.bf16.mxu0 %v2468_v58 }
 0x116   :  { %660 = vmatpush1.bf16.msra.mxu1 %v2472_v59  ;;  %701 = vmatpush1.bf16.msra.mxu0 %v2474_v60 }
 0x117   :  { %661 = vmatprep.subr.bf16.mxu1 %v2478_v61  ;;  %702 = vmatprep.subr.bf16.mxu0 %v2480_v62 }
 0x11a   :  { %662 = vmatpush1.bf16.msra.mxu1 %v2484_v63  ;;  %703 = vmatpush1.bf16.msra.mxu0 %v2486_v1 }
 0x11b   :  { %663 = vmatprep.subr.bf16.mxu1 %v2490_v2  ;;  %704 = vmatprep.subr.bf16.mxu0 %v2492_v3 }
 0x11e   :  { %664 = vmatpush1.bf16.msra.mxu1 %v2496_v4  ;;  %705 = vmatpush1.bf16.msra.mxu0 %v2498_v5 }
 0x11f   :  { %665 = vmatprep.subr.bf16.mxu1 %v2502_v6  ;;  %706 = vmatprep.subr.bf16.mxu0 %v2504_v7 }
 0x122   :  { %666 = vmatpush1.bf16.msra.mxu1 %v2508_v8  ;;  %707 = vmatpush1.bf16.msra.mxu0 %v2510_v9 }
 0x123   :  { %667 = vmatprep.subr.bf16.mxu1 %v2514_v10  ;;  %708 = vmatprep.subr.bf16.mxu0 %v2516_v11 }
 0x126   :  { %668 = vmatpush1.bf16.msra.mxu1 %v2520_v12  ;;  %709 = vmatpush1.bf16.msra.mxu0 %v2522_v13 }
 0x127   :  { %764 = vmatprep.subr.bf16.mxu1 %v2425_v36  ;;  %805 = vmatprep.subr.bf16.mxu0 %v2427_v37 }
 0x129   :  { %686 = vmatmul.mubr.bf16.vlgmr.msra.gmra.mxu1 %v460_v15  ;;  %727 = vmatmul.mubr.bf16.vlgmr.msra.gmra.mxu0 %v460_v15 }
 0x12a   :  { %765 = vmatpush1.bf16.msra.mxu1 %v2436_v45  ;;  %806 = vmatpush1.bf16.msra.mxu0 %v2438_v46 }
 0x12b   :  { %766 = vmatprep.subr.bf16.mxu1 %v2440_v48  ;;  %807 = vmatprep.subr.bf16.mxu0 %v2442_v49 }
 0x12c   :  { %796 = vmatprep.mubr.bf16.mxu1 %v2345_v38  ;;  %837 = vmatprep.mubr.bf16.mxu0 %v2345_v38 }
 0x12e   :  { %767 = vmatpush1.bf16.msra.mxu1 %v2446_v51  ;;  %808 = vmatpush1.bf16.msra.mxu0 %v2448_v52 }
 0x12f   :  { %768 = vmatprep.subr.bf16.mxu1 %v2452_v53  ;;  %809 = vmatprep.subr.bf16.mxu0 %v2454_v54 }
 0x132   :  { %769 = vmatpush1.bf16.msra.mxu1 %v2460_v55  ;;  %810 = vmatpush1.bf16.msra.mxu0 %v2462_v56 }
 0x133   :  { %770 = vmatprep.subr.bf16.mxu1 %v2466_v57  ;;  %811 = vmatprep.subr.bf16.mxu0 %v2468_v58 }
 0x136   :  { %771 = vmatpush1.bf16.msra.mxu1 %v2472_v59  ;;  %812 = vmatpush1.bf16.msra.mxu0 %v2474_v60 }
 0x137   :  { %772 = vmatprep.subr.bf16.mxu1 %v2478_v61  ;;  %813 = vmatprep.subr.bf16.mxu0 %v2480_v62 }
 0x13a   :  { %773 = vmatpush1.bf16.msra.mxu1 %v2484_v63  ;;  %814 = vmatpush1.bf16.msra.mxu0 %v2486_v1 }
 0x13b   :  { %774 = vmatprep.subr.bf16.mxu1 %v2490_v2  ;;  %815 = vmatprep.subr.bf16.mxu0 %v2492_v3 }
 0x13e   :  { %775 = vmatpush1.bf16.msra.mxu1 %v2496_v4  ;;  %816 = vmatpush1.bf16.msra.mxu0 %v2498_v5 }
 0x13f   :  { %776 = vmatprep.subr.bf16.mxu1 %v2502_v6  ;;  %817 = vmatprep.subr.bf16.mxu0 %v2504_v7 }
 0x142   :  { %777 = vmatpush1.bf16.msra.mxu1 %v2508_v8  ;;  %818 = vmatpush1.bf16.msra.mxu0 %v2510_v9 }
 0x143   :  { %778 = vmatprep.subr.bf16.mxu1 %v2514_v10  ;;  %819 = vmatprep.subr.bf16.mxu0 %v2516_v11 }
 0x146   :  { %779 = vmatpush1.bf16.msra.mxu1 %v2520_v12  ;;  %820 = vmatpush1.bf16.msra.mxu0 %v2522_v13 }
 0x147   :  { %894 = vmatprep.subr.bf16.mxu1 %v2425_v36  ;;  %935 = vmatprep.subr.bf16.mxu0 %v2427_v37 }
 0x1c9   :  { %v410_v16 = vpop.f32.mrf.mxu1  ;;  %v451_v17 = vpop.f32.mrf.mxu0 }
 0x1ca   :  { %v2567_v31 = vadd.f32 %v410_v16, %v199_v29 }
 0x1cb   :  { %v412_v18 = vpop.f32.mrf.mxu1  ;;  %v453_v19 = vpop.f32.mrf.mxu0 }
 0x1cc   :  { %v2569_v34 = vadd.f32 %v412_v18, %v203_v30 }
 0x1cd   :  { %v414_v20 = vpop.f32.mrf.mxu1  ;;  %v455_v21 = vpop.f32.mrf.mxu0 }
 0x1ce   :  { %v206_v20 = vsub.s32 2, %v197_v25  ;;  %v2573_v21 = vadd.f32 %v453_v19, %v211_v14  ;;  %v459_v19 = vld [vmem:[%s2857_s6 + $0x1] sm:$0x1] }
 0x1cf   :  { %v415_v22 = vpop.f32.mrf.mxu1  ;;  %v456_v23 = vpop.f32.mrf.mxu0 }
 0x1d0   :  { %v207_v18 = vrot.slane %v194_v27, %v206_v20 }
 0x1d2   :  { %v2576_v23 = vadd.f32 %v451_v17, %v207_v18 }
 0x1e9   :  { %v687_v32 = vpop.f32.mrf.mxu1  ;;  %v728_v33 = vpop.f32.mrf.mxu0 }
 0x1ea   :  { %v735_v35 = vadd.f32 %v687_v32, %v2567_v31  ;;  %v737_v28 = vadd.f32 %v728_v33, %v2576_v23 }
 0x1eb   :  { %v689_v40 = vpop.f32.mrf.mxu1  ;;  %v730_v41 = vpop.f32.mrf.mxu0 }
 0x1ec   :  { %v1881_v42 = vmul.f32 -1.442695, %v735_v35  ;;  %v736_v43 = vadd.f32 %v689_v40, %v2569_v34  ;;  %v738_v22 = vadd.f32 %v730_v41, %v2573_v21 }
 0x1ed   :  { %v691_v44 = vpop.f32.mrf.mxu1  ;;  %v732_v47 = vpop.f32.mrf.mxu0 }
 0x1ee   :  { %2068 = vpow2.f32 %v1881_v42  ;;  %v1882_v50 = vmul.f32 -1.442695, %v736_v43  ;;  %v1883_v24 = vmul.f32 -1.442695, %v738_v22 }
 0x1ef   :  { %v692_v15 = vpop.f32.mrf.mxu1  ;;  %v733_v16 = vpop.f32.mrf.mxu0 }
 0x1f0   :  { %2070 = vpow2.f32 %v1882_v50 }
 0x1f1   :  { %2072 = vpow2.f32 %v1883_v24 }
 0x1fb   :  { %v2069_v26 = vpop.eup %2068 }
 0x1fc   :  { %v742_v29 = vadd.f32 1.0, %v2069_v26 }
 0x1fd   :  { %v2071_v30 = vpop.eup %2070 }
 0x1fe   :  { %2074 = vrcp.f32 %v742_v29  ;;  %v748_v32 = vadd.f32 1.0, %v2071_v30  ;;  %v2073_v35 = vpop.eup %2072 }
 0x1ff   :  { %2076 = vtanh.f32 %v737_v28  ;;  %v755_v39 = vadd.f32 1.0, %v2073_v35 }
 0x200   :  { %2078 = vrcp.f32 %v748_v32 }
 0x201   :  { %2080 = vrcp.f32 %v755_v39 }
 0x20b   :  { %v2075_v25 = vpop.eup %2074 }
 0x20c   :  { %v2077_v27 = vpop.eup %2076 }
 0x20d   :  { %v2079_v17 = vpop.eup %2078  ;;  %v759_v40 = vmul.f32 %v2077_v27, %v2075_v25 }
 0x20e   :  { %v758_v41 = vmul.f32 %v2079_v17, %v459_v19  ;;  %v2081_v33 = vpop.eup %2080 }
 0x210   :  { %v2582_v42 = vadd.f32 %v759_v40, %v758_v41 }
 0x212   :  { %2082 = vtanh.f32 %v2582_v42 }
 0x21f   :  { %v2083_v43 = vpop.eup %2082 }
 0x220   :  { %v2585_v44 = vmul.f32 %v2083_v43, %v2081_v33 }
 0x222   :  { %v763_v47 = vpack.c.bf16 %v2585_v44, %v2585_v44 }
 0x224   :  { %797 = vmatmul.mubr.bf16.vlgmr.msra.gmra.mxu1 %v763_v47  ;;  %838 = vmatmul.mubr.bf16.vlgmr.msra.gmra.mxu0 %v763_v47 }
 0x225   :  { %895 = vmatpush1.bf16.msra.mxu1 %v2436_v45  ;;  %936 = vmatpush1.bf16.msra.mxu0 %v2438_v46 }
 0x226   :  { %896 = vmatprep.subr.bf16.mxu1 %v2440_v48  ;;  %937 = vmatprep.subr.bf16.mxu0 %v2442_v49 }
 0x227   :  { %926 = vmatprep.mubr.bf16.mxu1 %v2345_v38  ;;  %967 = vmatprep.mubr.bf16.mxu0 %v2345_v38 }
 0x229   :  { %897 = vmatpush1.bf16.msra.mxu1 %v2446_v51  ;;  %938 = vmatpush1.bf16.msra.mxu0 %v2448_v52 }
 0x22a   :  { %898 = vmatprep.subr.bf16.mxu1 %v2452_v53  ;;  %939 = vmatprep.subr.bf16.mxu0 %v2454_v54 }
 0x22d   :  { %899 = vmatpush1.bf16.msra.mxu1 %v2460_v55  ;;  %940 = vmatpush1.bf16.msra.mxu0 %v2462_v56 }
 0x22e   :  { %900 = vmatprep.subr.bf16.mxu1 %v2466_v57  ;;  %941 = vmatprep.subr.bf16.mxu0 %v2468_v58 }
 0x231   :  { %901 = vmatpush1.bf16.msra.mxu1 %v2472_v59  ;;  %942 = vmatpush1.bf16.msra.mxu0 %v2474_v60 }
 0x232   :  { %902 = vmatprep.subr.bf16.mxu1 %v2478_v61  ;;  %943 = vmatprep.subr.bf16.mxu0 %v2480_v62 }
 0x235   :  { %903 = vmatpush1.bf16.msra.mxu1 %v2484_v63  ;;  %944 = vmatpush1.bf16.msra.mxu0 %v2486_v1 }
 0x236   :  { %904 = vmatprep.subr.bf16.mxu1 %v2490_v2  ;;  %945 = vmatprep.subr.bf16.mxu0 %v2492_v3 }
 0x239   :  { %905 = vmatpush1.bf16.msra.mxu1 %v2496_v4  ;;  %946 = vmatpush1.bf16.msra.mxu0 %v2498_v5 }
 0x23a   :  { %906 = vmatprep.subr.bf16.mxu1 %v2502_v6  ;;  %947 = vmatprep.subr.bf16.mxu0 %v2504_v7 }
 0x23d   :  { %907 = vmatpush1.bf16.msra.mxu1 %v2508_v8  ;;  %948 = vmatpush1.bf16.msra.mxu0 %v2510_v9 }
 0x23e   :  { %908 = vmatprep.subr.bf16.mxu1 %v2514_v10  ;;  %949 = vmatprep.subr.bf16.mxu0 %v2516_v11 }
 0x241   :  { %909 = vmatpush1.bf16.msra.mxu1 %v2520_v12  ;;  %950 = vmatpush1.bf16.msra.mxu0 %v2522_v13 }
 0x242   :  { %1023 = vmatprep.subr.bf16.mxu1 %v2425_v36  ;;  %1064 = vmatprep.subr.bf16.mxu0 %v2427_v37 }
 0x2e4   :  { %v798_v50 = vpop.f32.mrf.mxu1  ;;  %v839_v14 = vpop.f32.mrf.mxu0 }
 0x2e5   :  { %v850_v15 = vrot.slane %v798_v50, 7  ;;  %v852_v27 = vrot.slane %v839_v14, 7 }
 0x2e6   :  { %v800_v16 = vpop.f32.mrf.mxu1  ;;  %v841_v20 = vpop.f32.mrf.mxu0 }
 0x2e7   :  { %v858_v18 = vadd.f32 %v850_v15, %v2567_v31  ;;  %v851_v22 = vrot.slane %v800_v16, 7  ;;  %v853_v25 = vrot.slane %v841_v20, 7  ;;  %v860_v40 = vadd.f32 %v852_v27, %v2576_v23 }
 0x2e8   :  { %v802_v24 = vpop.f32.mrf.mxu1  ;;  %v843_v26 = vpop.f32.mrf.mxu0  ;;  %v882_v16 = vrot.slane %v2582_v42, 7 }
 0x2e9   :  { %v1884_v28 = vmul.f32 -1.442695, %v858_v18  ;;  %v859_v29 = vadd.f32 %v851_v22, %v2569_v34  ;;  %v861_v19 = vadd.f32 %v853_v25, %v2573_v21 }
 0x2ea   :  { %v803_v30 = vpop.f32.mrf.mxu1  ;;  %v844_v32 = vpop.f32.mrf.mxu0 }
 0x2eb   :  { %2084 = vpow2.f32 %v1884_v28  ;;  %v1885_v35 = vmul.f32 -1.442695, %v859_v29  ;;  %v1886_v17 = vmul.f32 -1.442695, %v861_v19 }
 0x2ed   :  { %2086 = vpow2.f32 %v1885_v35 }
 0x2ee   :  { %2088 = vpow2.f32 %v1886_v17 }
 0x2f8   :  { %v2085_v39 = vpop.eup %2084 }
 0x2f9   :  { %v865_v41 = vadd.f32 1.0, %v2085_v39 }
 0x2fa   :  { %v2087_v33 = vpop.eup %2086 }
 0x2fb   :  { %2090 = vrcp.f32 %v865_v41  ;;  %v871_v43 = vadd.f32 1.0, %v2087_v33  ;;  %v2089_v47 = vpop.eup %2088 }
 0x2fc   :  { %2092 = vtanh.f32 %v860_v40  ;;  %v878_v18 = vadd.f32 1.0, %v2089_v47 }
 0x2fd   :  { %2094 = vrcp.f32 %v871_v43 }
 0x2fe   :  { %2096 = vrcp.f32 %v878_v18 }
 0x308   :  { %v2091_v50 = vpop.eup %2090 }
 0x309   :  { %v2093_v15 = vpop.eup %2092 }
 0x30a   :  { %v2095_v20 = vpop.eup %2094  ;;  %v885_v22 = vmul.f32 %v2093_v15, %v2091_v50 }
 0x30b   :  { %v884_v14 = vmul.f32 %v2095_v20, %v882_v16  ;;  %v2097_v26 = vpop.eup %2096 }
 0x30d   :  { %v2628_v24 = vadd.f32 %v885_v22, %v884_v14 }
 0x30f   :  { %2098 = vtanh.f32 %v2628_v24 }
 0x31c   :  { %v2099_v28 = vpop.eup %2098 }
 0x31d   :  { %v2631_v29 = vmul.f32 %v2099_v28, %v2097_v26 }
 0x31f   :  { %v889_v30 = vpack.c.bf16 %v2631_v29, %v2631_v29 }
 0x321   :  { %v891_v32 = vshrl.u32 %v889_v30, 16 }
 0x323   :  { %927 = vmatmul.mubr.bf16.vlgmr.msra.gmra.mxu1 %v891_v32  ;;  %968 = vmatmul.mubr.bf16.vlgmr.msra.gmra.mxu0 %v891_v32 }
 0x324   :  { %1024 = vmatpush1.bf16.msra.mxu1 %v2436_v45  ;;  %1065 = vmatpush1.bf16.msra.mxu0 %v2438_v46 }
 0x325   :  { %1025 = vmatprep.subr.bf16.mxu1 %v2440_v48  ;;  %1066 = vmatprep.subr.bf16.mxu0 %v2442_v49 }
 0x326   :  { %1055 = vmatprep.mubr.bf16.mxu1 %v2345_v38  ;;  %1096 = vmatprep.mubr.bf16.mxu0 %v2345_v38 }
 0x328   :  { %1026 = vmatpush1.bf16.msra.mxu1 %v2446_v51  ;;  %1067 = vmatpush1.bf16.msra.mxu0 %v2448_v52 }
 0x329   :  { %1027 = vmatprep.subr.bf16.mxu1 %v2452_v53  ;;  %1068 = vmatprep.subr.bf16.mxu0 %v2454_v54 }
 0x32c   :  { %1028 = vmatpush1.bf16.msra.mxu1 %v2460_v55  ;;  %1069 = vmatpush1.bf16.msra.mxu0 %v2462_v56 }
 0x32d   :  { %1029 = vmatprep.subr.bf16.mxu1 %v2466_v57  ;;  %1070 = vmatprep.subr.bf16.mxu0 %v2468_v58 }
 0x330   :  { %1030 = vmatpush1.bf16.msra.mxu1 %v2472_v59  ;;  %1071 = vmatpush1.bf16.msra.mxu0 %v2474_v60 }
 0x331   :  { %1031 = vmatprep.subr.bf16.mxu1 %v2478_v61  ;;  %1072 = vmatprep.subr.bf16.mxu0 %v2480_v62 }
 0x334   :  { %1032 = vmatpush1.bf16.msra.mxu1 %v2484_v63  ;;  %1073 = vmatpush1.bf16.msra.mxu0 %v2486_v1 }
 0x335   :  { %1033 = vmatprep.subr.bf16.mxu1 %v2490_v2  ;;  %1074 = vmatprep.subr.bf16.mxu0 %v2492_v3 }
 0x338   :  { %1034 = vmatpush1.bf16.msra.mxu1 %v2496_v4  ;;  %1075 = vmatpush1.bf16.msra.mxu0 %v2498_v5 }
 0x339   :  { %1035 = vmatprep.subr.bf16.mxu1 %v2502_v6  ;;  %1076 = vmatprep.subr.bf16.mxu0 %v2504_v7 }
 0x33c   :  { %1036 = vmatpush1.bf16.msra.mxu1 %v2508_v8  ;;  %1077 = vmatpush1.bf16.msra.mxu0 %v2510_v9 }
 0x33d   :  { %1037 = vmatprep.subr.bf16.mxu1 %v2514_v10  ;;  %1078 = vmatprep.subr.bf16.mxu0 %v2516_v11 }
 0x340   :  { %1038 = vmatpush1.bf16.msra.mxu1 %v2520_v12  ;;  %1079 = vmatpush1.bf16.msra.mxu0 %v2522_v13 }
 0x341   :  { %1154 = vmatprep.subr.bf16.mxu1 %v2425_v36  ;;  %1195 = vmatprep.subr.bf16.mxu0 %v2427_v37 }
 0x3e3   :  { %v928_v42 = vpop.f32.mrf.mxu1  ;;  %v969_v35 = vpop.f32.mrf.mxu0 }
 0x3e4   :  { %v980_v25 = vrot.slane %v928_v42, 6  ;;  %v982_v18 = vrot.slane %v969_v35, 6 }
 0x3e5   :  { %v930_v19 = vpop.f32.mrf.mxu1  ;;  %v971_v27 = vpop.f32.mrf.mxu0 }
 0x3e6   :  { %v988_v17 = vadd.f32 %v980_v25, %v2567_v31  ;;  %v981_v39 = vrot.slane %v930_v19, 6  ;;  %v983_v16 = vrot.slane %v971_v27, 6  ;;  %v990_v26 = vadd.f32 %v982_v18, %v2576_v23 }
 0x3e7   :  { %v932_v40 = vpop.f32.mrf.mxu1  ;;  %v973_v41 = vpop.f32.mrf.mxu0 }
 0x3e8   :  { %v1887_v33 = vmul.f32 -1.442695, %v988_v17  ;;  %v989_v43 = vadd.f32 %v981_v39, %v2569_v34  ;;  %v991_v20 = vadd.f32 %v983_v16, %v2573_v21  ;;  %v1012_v17 = vrot.slane %v2628_v24, 7 }
 0x3e9   :  { %v933_v47 = vpop.f32.mrf.mxu1  ;;  %v974_v50 = vpop.f32.mrf.mxu0 }
 0x3ea   :  { %2100 = vpow2.f32 %v1887_v33  ;;  %v1888_v15 = vmul.f32 -1.442695, %v989_v43  ;;  %v1889_v22 = vmul.f32 -1.442695, %v991_v20  ;;  %v1677_v50 = vsel %vm1674_vm2, %v2585_v44, %v2631_v29 }
 0x3ec   :  { %2102 = vpow2.f32 %v1888_v15 }
 0x3ed   :  { %2104 = vpow2.f32 %v1889_v22 }
 0x3f7   :  { %v2101_v14 = vpop.eup %2100 }
 0x3f8   :  { %v995_v28 = vadd.f32 1.0, %v2101_v14 }
 0x3f9   :  { %v2103_v30 = vpop.eup %2102 }
 0x3fa   :  { %2106 = vrcp.f32 %v995_v28  ;;  %v1001_v32 = vadd.f32 1.0, %v2103_v30  ;;  %v2105_v42 = vpop.eup %2104 }
 0x3fb   :  { %2108 = vtanh.f32 %v990_v26  ;;  %v1008_v39 = vadd.f32 1.0, %v2105_v42 }
 0x3fc   :  { %2110 = vrcp.f32 %v1001_v32 }
 0x3fd   :  { %2112 = vrcp.f32 %v1008_v39 }
 0x407   :  { %v2107_v25 = vpop.eup %2106 }
 0x408   :  { %v2109_v19 = vpop.eup %2108 }
 0x409   :  { %v2111_v27 = vpop.eup %2110  ;;  %v1015_v40 = vmul.f32 %v2109_v19, %v2107_v25 }
 0x40a   :  { %v1014_v35 = vmul.f32 %v2111_v27, %v1012_v17  ;;  %v2113_v33 = vpop.eup %2112 }
 0x40c   :  { %v2674_v41 = vadd.f32 %v1015_v40, %v1014_v35 }
 0x40e   :  { %2114 = vtanh.f32 %v2674_v41 }
 0x41b   :  { %v2115_v43 = vpop.eup %2114 }
 0x41c   :  { %v1018_v47 = vmul.f32 %v2115_v43, %v2113_v33 }
 0x41e   :  { %v1019_v15 = vpack.c.bf16 %v1018_v47, %v1018_v47  ;;  %v2680_v24 = vsel %vm1678_vm3, %v1677_v50, %v1018_v47 }
 0x420   :  { %v1021_v16 = vrot.slane %v1019_v15, 1 }
 0x422   :  { %1056 = vmatmul.mubr.bf16.vlgmr.msra.gmra.mxu1 %v1021_v16  ;;  %1097 = vmatmul.mubr.bf16.vlgmr.msra.gmra.mxu0 %v1021_v16 }
 0x423   :  { %1155 = vmatpush1.bf16.msra.mxu1 %v2436_v45  ;;  %1196 = vmatpush1.bf16.msra.mxu0 %v2438_v46 }
 0x424   :  { %1156 = vmatprep.subr.bf16.mxu1 %v2440_v48  ;;  %1197 = vmatprep.subr.bf16.mxu0 %v2442_v49 }
 0x425   :  { %1186 = vmatprep.mubr.bf16.mxu1 %v2345_v38  ;;  %1227 = vmatprep.mubr.bf16.mxu0 %v2345_v38 }
 0x427   :  { %1157 = vmatpush1.bf16.msra.mxu1 %v2446_v51  ;;  %1198 = vmatpush1.bf16.msra.mxu0 %v2448_v52 }
 0x428   :  { %1158 = vmatprep.subr.bf16.mxu1 %v2452_v53  ;;  %1199 = vmatprep.subr.bf16.mxu0 %v2454_v54 }
 0x42b   :  { %1159 = vmatpush1.bf16.msra.mxu1 %v2460_v55  ;;  %1200 = vmatpush1.bf16.msra.mxu0 %v2462_v56 }
 0x42c   :  { %1160 = vmatprep.subr.bf16.mxu1 %v2466_v57  ;;  %1201 = vmatprep.subr.bf16.mxu0 %v2468_v58 }
 0x42f   :  { %1161 = vmatpush1.bf16.msra.mxu1 %v2472_v59  ;;  %1202 = vmatpush1.bf16.msra.mxu0 %v2474_v60 }
 0x430   :  { %1162 = vmatprep.subr.bf16.mxu1 %v2478_v61  ;;  %1203 = vmatprep.subr.bf16.mxu0 %v2480_v62 }
 0x433   :  { %1163 = vmatpush1.bf16.msra.mxu1 %v2484_v63  ;;  %1204 = vmatpush1.bf16.msra.mxu0 %v2486_v1 }
 0x434   :  { %1164 = vmatprep.subr.bf16.mxu1 %v2490_v2  ;;  %1205 = vmatprep.subr.bf16.mxu0 %v2492_v3 }
 0x437   :  { %1165 = vmatpush1.bf16.msra.mxu1 %v2496_v4  ;;  %1206 = vmatpush1.bf16.msra.mxu0 %v2498_v5 }
 0x438   :  { %1166 = vmatprep.subr.bf16.mxu1 %v2502_v6  ;;  %1207 = vmatprep.subr.bf16.mxu0 %v2504_v7 }
 0x43b   :  { %1167 = vmatpush1.bf16.msra.mxu1 %v2508_v8  ;;  %1208 = vmatpush1.bf16.msra.mxu0 %v2510_v9 }
 0x43c   :  { %1168 = vmatprep.subr.bf16.mxu1 %v2514_v10  ;;  %1209 = vmatprep.subr.bf16.mxu0 %v2516_v11 }
 0x43f   :  { %1169 = vmatpush1.bf16.msra.mxu1 %v2520_v12  ;;  %1210 = vmatpush1.bf16.msra.mxu0 %v2522_v13 }
 0x440   :  { %1283 = vmatprep.subr.bf16.mxu1 %v2425_v36  ;;  %1324 = vmatprep.subr.bf16.mxu0 %v2427_v37 }
 0x4e2   :  { %v1057_v44 = vpop.f32.mrf.mxu1  ;;  %v1098_v29 = vpop.f32.mrf.mxu0 }
 0x4e3   :  { %v1109_v20 = vrot.slane %v1057_v44, 5  ;;  %v1111_v40 = vrot.slane %v1098_v29, 5 }
 0x4e4   :  { %v1059_v18 = vpop.f32.mrf.mxu1  ;;  %v1100_v22 = vpop.f32.mrf.mxu0 }
 0x4e5   :  { %v1117_v14 = vadd.f32 %v1109_v20, %v2567_v31  ;;  %v1110_v26 = vrot.slane %v1059_v18, 5  ;;  %v1112_v27 = vrot.slane %v1100_v22, 5  ;;  %v1119_v43 = vadd.f32 %v1111_v40, %v2576_v23 }
 0x4e6   :  { %v1061_v28 = vpop.f32.mrf.mxu1  ;;  %v1102_v30 = vpop.f32.mrf.mxu0  ;;  %v1141_v18 = vrot.slane %v2674_v41, 7 }
 0x4e7   :  { %v1890_v32 = vmul.f32 -1.442695, %v1117_v14  ;;  %v1118_v42 = vadd.f32 %v1110_v26, %v2569_v34  ;;  %v1120_v39 = vadd.f32 %v1112_v27, %v2573_v21 }
 0x4e8   :  { %v1062_v25 = vpop.f32.mrf.mxu1  ;;  %v1103_v19 = vpop.f32.mrf.mxu0 }
 0x4e9   :  { %2116 = vpow2.f32 %v1890_v32  ;;  %v1891_v17 = vmul.f32 -1.442695, %v1118_v42  ;;  %v1892_v35 = vmul.f32 -1.442695, %v1120_v39 }
 0x4eb   :  { %2118 = vpow2.f32 %v1891_v17 }
 0x4ec   :  { %2120 = vpow2.f32 %v1892_v35 }
 0x4f6   :  { %v2117_v33 = vpop.eup %2116 }
 0x4f7   :  { %v1124_v47 = vadd.f32 1.0, %v2117_v33 }
 0x4f8   :  { %v2119_v50 = vpop.eup %2118 }
 0x4f9   :  { %2122 = vrcp.f32 %v1124_v47  ;;  %v1130_v15 = vadd.f32 1.0, %v2119_v50  ;;  %v2121_v16 = vpop.eup %2120 }
 0x4fa   :  { %2124 = vtanh.f32 %v1119_v43  ;;  %v1137_v14 = vadd.f32 1.0, %v2121_v16 }
 0x4fb   :  { %2126 = vrcp.f32 %v1130_v15 }
 0x4fc   :  { %2128 = vrcp.f32 %v1137_v14 }
 0x506   :  { %v2123_v44 = vpop.eup %2122 }
 0x507   :  { %v2125_v20 = vpop.eup %2124 }
 0x508   :  { %v2127_v22 = vpop.eup %2126  ;;  %v1144_v26 = vmul.f32 %v2125_v20, %v2123_v44 }
 0x509   :  { %v1143_v29 = vmul.f32 %v2127_v22, %v1141_v18  ;;  %v2129_v30 = vpop.eup %2128 }
 0x50b   :  { %v2721_v28 = vadd.f32 %v1144_v26, %v1143_v29 }
 0x50d   :  { %2130 = vtanh.f32 %v2721_v28 }
 0x51a   :  { %v2131_v32 = vpop.eup %2130 }
 0x51b   :  { %v1147_v42 = vmul.f32 %v2131_v32, %v2129_v30 }
 0x51d   :  { %v1148_v25 = vpack.c.bf16 %v1147_v42, %v1147_v42  ;;  %v2725_v19 = vsel %vm1680_vm4, %v2680_v24, %v1147_v42 }
 0x51f   :  { %v1150_v17 = vshrl.u32 %v1148_v25, 16 }
 0x521   :  { %v1152_v27 = vrot.slane %v1150_v17, 1 }
 0x523   :  { %1187 = vmatmul.mubr.bf16.vlgmr.msra.gmra.mxu1 %v1152_v27  ;;  %1228 = vmatmul.mubr.bf16.vlgmr.msra.gmra.mxu0 %v1152_v27 }
 0x524   :  { %1284 = vmatpush1.bf16.msra.mxu1 %v2436_v45  ;;  %1325 = vmatpush1.bf16.msra.mxu0 %v2438_v46 }
 0x525   :  { %1285 = vmatprep.subr.bf16.mxu1 %v2440_v48  ;;  %1326 = vmatprep.subr.bf16.mxu0 %v2442_v49 }
 0x526   :  { %1315 = vmatprep.mubr.bf16.mxu1 %v2345_v38  ;;  %1356 = vmatprep.mubr.bf16.mxu0 %v2345_v38 }
 0x528   :  { %1286 = vmatpush1.bf16.msra.mxu1 %v2446_v51  ;;  %1327 = vmatpush1.bf16.msra.mxu0 %v2448_v52 }
 0x529   :  { %1287 = vmatprep.subr.bf16.mxu1 %v2452_v53  ;;  %1328 = vmatprep.subr.bf16.mxu0 %v2454_v54 }
 0x52c   :  { %1288 = vmatpush1.bf16.msra.mxu1 %v2460_v55  ;;  %1329 = vmatpush1.bf16.msra.mxu0 %v2462_v56 }
 0x52d   :  { %1289 = vmatprep.subr.bf16.mxu1 %v2466_v57  ;;  %1330 = vmatprep.subr.bf16.mxu0 %v2468_v58 }
 0x530   :  { %1290 = vmatpush1.bf16.msra.mxu1 %v2472_v59  ;;  %1331 = vmatpush1.bf16.msra.mxu0 %v2474_v60 }
 0x531   :  { %1291 = vmatprep.subr.bf16.mxu1 %v2478_v61  ;;  %1332 = vmatprep.subr.bf16.mxu0 %v2480_v62 }
 0x534   :  { %1292 = vmatpush1.bf16.msra.mxu1 %v2484_v63  ;;  %1333 = vmatpush1.bf16.msra.mxu0 %v2486_v1 }
 0x535   :  { %1293 = vmatprep.subr.bf16.mxu1 %v2490_v2  ;;  %1334 = vmatprep.subr.bf16.mxu0 %v2492_v3 }
 0x538   :  { %1294 = vmatpush1.bf16.msra.mxu1 %v2496_v4  ;;  %1335 = vmatpush1.bf16.msra.mxu0 %v2498_v5 }
 0x539   :  { %1295 = vmatprep.subr.bf16.mxu1 %v2502_v6  ;;  %1336 = vmatprep.subr.bf16.mxu0 %v2504_v7 }
 0x53c   :  { %1296 = vmatpush1.bf16.msra.mxu1 %v2508_v8  ;;  %1337 = vmatpush1.bf16.msra.mxu0 %v2510_v9 }
 0x53d   :  { %1297 = vmatprep.subr.bf16.mxu1 %v2514_v10  ;;  %1338 = vmatprep.subr.bf16.mxu0 %v2516_v11 }
 0x540   :  { %1298 = vmatpush1.bf16.msra.mxu1 %v2520_v12  ;;  %1339 = vmatpush1.bf16.msra.mxu0 %v2522_v13 }
 0x541   :  { %1414 = vmatprep.subr.bf16.mxu1 %v2425_v36  ;;  %1455 = vmatprep.subr.bf16.mxu0 %v2427_v37 }
 0x5e3   :  { %v1188_v41 = vpop.f32.mrf.mxu1  ;;  %v1229_v24 = vpop.f32.mrf.mxu0 }
 0x5e4   :  { %v1240_v39 = vrot.slane %v1188_v41, 4  ;;  %v1242_v22 = vrot.slane %v1229_v24, 4  ;;  %v1272_v41 = vrot.slane %v2721_v28, 7 }
 0x5e5   :  { %v1190_v40 = vpop.f32.mrf.mxu1  ;;  %v1231_v35 = vpop.f32.mrf.mxu0 }
 0x5e6   :  { %v1248_v33 = vadd.f32 %v1240_v39, %v2567_v31  ;;  %v1241_v43 = vrot.slane %v1190_v40, 4  ;;  %v1243_v36 = vrot.slane %v1231_v35, 4  ;;  %v1250_v29 = vadd.f32 %v1242_v22, %v2576_v23 }
 0x5e7   :  { %v1192_v47 = vpop.f32.mrf.mxu1  ;;  %v1233_v50 = vpop.f32.mrf.mxu0 }
 0x5e8   :  { %v1893_v15 = vmul.f32 -1.442695, %v1248_v33  ;;  %v1249_v16 = vadd.f32 %v1241_v43, %v2569_v34  ;;  %v1251_v37 = vadd.f32 %v1243_v36, %v2573_v21 }
 0x5e9   :  { %v1193_v44 = vpop.f32.mrf.mxu1  ;;  %v1234_v20 = vpop.f32.mrf.mxu0 }
 0x5ea   :  { %2132 = vpow2.f32 %v1893_v15  ;;  %v1894_v18 = vmul.f32 -1.442695, %v1249_v16  ;;  %v1895_v14 = vmul.f32 -1.442695, %v1251_v37 }
 0x5ec   :  { %2134 = vpow2.f32 %v1894_v18 }
 0x5ed   :  { %2136 = vpow2.f32 %v1895_v14 }
 0x5f7   :  { %v2133_v26 = vpop.eup %2132 }
 0x5f8   :  { %v1255_v30 = vadd.f32 1.0, %v2133_v26 }
 0x5f9   :  { %v2135_v32 = vpop.eup %2134 }
 0x5fa   :  { %2138 = vrcp.f32 %v1255_v30  ;;  %v1261_v42 = vadd.f32 1.0, %v2135_v32  ;;  %v2137_v25 = vpop.eup %2136  ;;  %v2198_v32 = vld [vmem:[#allocation4 + $0xe0] ss:$16 sps:$4 sm:$0xff]  }
 0x5fb   :  { %2140 = vtanh.f32 %v1250_v29  ;;  %v1268_v40 = vadd.f32 1.0, %v2137_v25  ;;  %v2200_v25 = vld [vmem:[#allocation4 + $0xc4] ss:$16 sps:$4 sm:$0xff]  }
 0x5fc   :  { %2142 = vrcp.f32 %v1261_v42  ;;  %v2199_v42 = vld [vmem:[#allocation4 + $0xe8] ss:$16 sps:$4 sm:$0xff]  }
 0x5fd   :  { %2144 = vrcp.f32 %v1268_v40  ;;  %v2205_v40 = vld [vmem:[#allocation4 + $0xac] ss:$16 sps:$4 sm:$0xff]  }
 0x607   :  { %v2139_v17 = vpop.eup %2138 }
 0x608   :  { %v2141_v27 = vpop.eup %2140 }
 0x609   :  { %v2143_v39 = vpop.eup %2142  ;;  %v1275_v35 = vmul.f32 %v2141_v27, %v2139_v17  ;;  %v2201_v17 = vld [vmem:[#allocation4 + $0xcc] ss:$16 sps:$4 sm:$0xff]   ;;  %v2202_v27 = vld [vmem:[#allocation4 + $0xc0] ss:$16 sps:$4 sm:$0xff]  }
 0x60a   :  { %v1274_v24 = vmul.f32 %v2143_v39, %v1272_v41  ;;  %v2145_v43 = vpop.eup %2144  ;;  %v2203_v41 = vld [vmem:[#allocation4 + $0xc8] ss:$16 sps:$4 sm:$0xff]   ;;  %v2204_v39 = vld [vmem:[#allocation4 + $0xa4] ss:$16 sps:$4 sm:$0xff]  }
 0x60c   :  { %v2766_v33 = vadd.f32 %v1275_v35, %v1274_v24  ;;  %v2206_v35 = vld [vmem:[#allocation4 + $0xa0] ss:$16 sps:$4 sm:$0xff]   ;;  %v2207_v24 = vld [vmem:[#allocation4 + $0xa8] ss:$16 sps:$4 sm:$0xff]  }
 0x60e   :  { %2146 = vtanh.f32 %v2766_v33 }
 0x61b   :  { %v2147_v47 = vpop.eup %2146 }
 0x61c   :  { %v1278_v50 = vmul.f32 %v2147_v47, %v2145_v43  ;;  %v2209_v43 = vld [vmem:[#allocation4 + $0x8c] ss:$16 sps:$4 sm:$0xff]   ;;  %v2210_v47 = vld [vmem:[#allocation4 + $0x80] ss:$16 sps:$4 sm:$0xff]  }
 0x61e   :  { %v1279_v15 = vpack.c.bf16 %v1278_v50, %v1278_v50  ;;  %v2770_v16 = vsel %vm1682_vm5, %v2725_v19, %v1278_v50  ;;  %v2211_v50 = vld [vmem:[#allocation4 + $0x88] ss:$16 sps:$4 sm:$0xff]  }
 0x620   :  { %v1281_v44 = vrot.slane %v1279_v15, 2  ;;  %v2213_v15 = vld [vmem:[#allocation4 + $0x6c] ss:$16 sps:$4 sm:$0xff]  }
 0x622   :  { %1316 = vmatmul.mubr.bf16.vlgmr.msra.gmra.mxu1 %v1281_v44  ;;  %1357 = vmatmul.mubr.bf16.vlgmr.msra.gmra.mxu0 %v1281_v44  ;;  %v2215_v44 = vld [vmem:[#allocation4 + $0x68] ss:$16 sps:$4 sm:$0xff]  }
 0x623   :  { %1415 = vmatpush1.bf16.msra.mxu1 %v2436_v45  ;;  %1456 = vmatpush1.bf16.msra.mxu0 %v2438_v46  ;;  %v2196_v45 = vld [vmem:[#allocation4 + $0xe4] ss:$16 sps:$4 sm:$0xff]   ;;  %v2197_v46 = vld [vmem:[#allocation4 + $0xec] ss:$16 sps:$4 sm:$0xff]  }
 0x624   :  { %1416 = vmatprep.subr.bf16.mxu1 %v2440_v48  ;;  %1457 = vmatprep.subr.bf16.mxu0 %v2442_v49 }
 0x625   :  { %1446 = vmatprep.mubr.bf16.mxu1 %v2345_v38  ;;  %1487 = vmatprep.mubr.bf16.mxu0 %v2345_v38 }
 0x627   :  { %1417 = vmatpush1.bf16.msra.mxu1 %v2446_v51  ;;  %1458 = vmatpush1.bf16.msra.mxu0 %v2448_v52 }
 0x628   :  { %1418 = vmatprep.subr.bf16.mxu1 %v2452_v53  ;;  %1459 = vmatprep.subr.bf16.mxu0 %v2454_v54 }
 0x62b   :  { %1419 = vmatpush1.bf16.msra.mxu1 %v2460_v55  ;;  %1460 = vmatpush1.bf16.msra.mxu0 %v2462_v56 }
 0x62c   :  { %1420 = vmatprep.subr.bf16.mxu1 %v2466_v57  ;;  %1461 = vmatprep.subr.bf16.mxu0 %v2468_v58 }
 0x62f   :  { %1421 = vmatpush1.bf16.msra.mxu1 %v2472_v59  ;;  %1462 = vmatpush1.bf16.msra.mxu0 %v2474_v60 }
 0x630   :  { %1422 = vmatprep.subr.bf16.mxu1 %v2478_v61  ;;  %1463 = vmatprep.subr.bf16.mxu0 %v2480_v62 }
 0x633   :  { %1423 = vmatpush1.bf16.msra.mxu1 %v2484_v63  ;;  %1464 = vmatpush1.bf16.msra.mxu0 %v2486_v1 }
 0x634   :  { %1424 = vmatprep.subr.bf16.mxu1 %v2490_v2  ;;  %1465 = vmatprep.subr.bf16.mxu0 %v2492_v3 }
 0x637   :  { %1425 = vmatpush1.bf16.msra.mxu1 %v2496_v4  ;;  %1466 = vmatpush1.bf16.msra.mxu0 %v2498_v5 }
 0x638   :  { %1426 = vmatprep.subr.bf16.mxu1 %v2502_v6  ;;  %1467 = vmatprep.subr.bf16.mxu0 %v2504_v7 }
 0x63b   :  { %1427 = vmatpush1.bf16.msra.mxu1 %v2508_v8  ;;  %1468 = vmatpush1.bf16.msra.mxu0 %v2510_v9 }
 0x63c   :  { %1428 = vmatprep.subr.bf16.mxu1 %v2514_v10  ;;  %1469 = vmatprep.subr.bf16.mxu0 %v2516_v11 }
 0x63f   :  { %1429 = vmatpush1.bf16.msra.mxu1 %v2520_v12  ;;  %1470 = vmatpush1.bf16.msra.mxu0 %v2522_v13  ;;  %v1401_v12 = vrot.slane %v2766_v33, 7  ;;  %v2208_v33 = vld [vmem:[#allocation4 + $0x84] ss:$16 sps:$4 sm:$0xff]  }
 0x640   :  { %1543 = vmatprep.subr.bf16.mxu1 %v2196_v45  ;;  %1584 = vmatprep.subr.bf16.mxu0 %v2197_v46  ;;  %v2216_v45 = vld [vmem:[#allocation4 + $0x44] ss:$16 sps:$4 sm:$0xff]   ;;  %v2217_v46 = vld [vmem:[#allocation4 + $0x4c] ss:$16 sps:$4 sm:$0xff]  }
 0x6e2   :  { %v1317_v48 = vpop.f32.mrf.mxu1  ;;  %v1358_v49 = vpop.f32.mrf.mxu0 }
 0x6e3   :  { %v1369_v51 = vrot.slane %v1317_v48, 3  ;;  %v1371_v2 = vrot.slane %v1358_v49, 3  ;;  %v2218_v48 = vld [vmem:[#allocation4 + $0x40] ss:$16 sps:$4 sm:$0xff]   ;;  %v2219_v49 = vld [vmem:[#allocation4 + $0x48] ss:$16 sps:$4 sm:$0xff]  }
 0x6e4   :  { %v1319_v52 = vpop.f32.mrf.mxu1  ;;  %v1360_v53 = vpop.f32.mrf.mxu0 }
 0x6e5   :  { %v1377_v54 = vadd.f32 %v1369_v51, %v2567_v31  ;;  %v1370_v55 = vrot.slane %v1319_v52, 3  ;;  %v1372_v63 = vrot.slane %v1360_v53, 3  ;;  %v1379_v5 = vadd.f32 %v1371_v2, %v2576_v23  ;;  %v2220_v51 = vld [vmem:[#allocation4 + $0x24] ss:$16 sps:$4 sm:$0xff]   ;;  %v2221_v52 = vld [vmem:[#allocation4 + $0x2c] ss:$16 sps:$4 sm:$0xff]  }
 0x6e6   :  { %v1321_v56 = vpop.f32.mrf.mxu1  ;;  %v1362_v57 = vpop.f32.mrf.mxu0  ;;  %v2222_v53 = vld [vmem:[#allocation4 + $0x20] ss:$16 sps:$4 sm:$0xff]  }
 0x6e7   :  { %v1896_v58 = vmul.f32 -1.442695, %v1377_v54  ;;  %v1378_v59 = vadd.f32 %v1370_v55, %v2569_v34  ;;  %v1380_v1 = vadd.f32 %v1372_v63, %v2573_v21  ;;  %v2223_v54 = vld [vmem:[#allocation4 + $0x28] ss:$16 sps:$4 sm:$0xff]   ;;  %v2224_v55 = vld [vmem:[#allocation4 + $0x4] ss:$16 sps:$4 sm:$0xff]  }
 0x6e8   :  { %v1322_v60 = vpop.f32.mrf.mxu1  ;;  %v1363_v61 = vpop.f32.mrf.mxu0  ;;  %v2225_v56 = vld [vmem:[#allocation4 + $0xc] ss:$16 sps:$4 sm:$0xff]   ;;  %v2226_v57 = vld [vmem:[#allocation4] ss:$16 sps:$4 sm:$0xff]  }
 0x6e9   :  { %2148 = vpow2.f32 %v1896_v58  ;;  %v1897_v62 = vmul.f32 -1.442695, %v1378_v59  ;;  %v1898_v3 = vmul.f32 -1.442695, %v1380_v1  ;;  %v2227_v58 = vld [vmem:[#allocation4 + $0x8] ss:$16 sps:$4 sm:$0xff]  }
 0x6eb   :  { %2150 = vpow2.f32 %v1897_v62 }
 0x6ec   :  { %2152 = vpow2.f32 %v1898_v3 }
 0x6f6   :  { %v2149_v4 = vpop.eup %2148 }
 0x6f7   :  { %v1384_v6 = vadd.f32 1.0, %v2149_v4 }
 0x6f8   :  { %v2151_v7 = vpop.eup %2150 }
 0x6f9   :  { %2154 = vrcp.f32 %v1384_v6  ;;  %v1390_v8 = vadd.f32 1.0, %v2151_v7  ;;  %v2153_v9 = vpop.eup %2152 }
 0x6fa   :  { %2156 = vtanh.f32 %v1379_v5  ;;  %v1397_v28 = vadd.f32 1.0, %v2153_v9 }
 0x6fb   :  { %2158 = vrcp.f32 %v1390_v8 }
 0x6fc   :  { %2160 = vrcp.f32 %v1397_v28 }
 0x706   :  { %v2155_v10 = vpop.eup %2154 }
 0x707   :  { %v2157_v11 = vpop.eup %2156 }
 0x708   :  { %v2159_v13 = vpop.eup %2158  ;;  %v1404_v19 = vmul.f32 %v2157_v11, %v2155_v10 }
 0x709   :  { %v1403_v20 = vmul.f32 %v2159_v13, %v1401_v12  ;;  %v2161_v36 = vpop.eup %2160 }
 0x70b   :  { %v2809_v18 = vadd.f32 %v1404_v19, %v1403_v20 }
 0x70d   :  { %2162 = vtanh.f32 %v2809_v18 }
 0x71a   :  { %v2163_v37 = vpop.eup %2162 }
 0x71b   :  { %v1407_v22 = vmul.f32 %v2163_v37, %v2161_v36 }
 0x71d   :  { %v1408_v14 = vpack.c.bf16 %v1407_v22, %v1407_v22  ;;  %v2813_v26 = vsel %vm1684_vm6, %v2770_v16, %v1407_v22  ;;  %v2214_v16 = vld [vmem:[#allocation4 + $0x60] ss:$16 sps:$4 sm:$0xff]  }
 0x71f   :  { %v1410_v29 = vshrl.u32 %v1408_v14, 16 }
 0x721   :  { %v1412_v30 = vrot.slane %v1410_v29, 2 }
 0x723   :  { %1447 = vmatmul.mubr.bf16.vlgmr.msra.gmra.mxu1 %v1412_v30  ;;  %1488 = vmatmul.mubr.bf16.vlgmr.msra.gmra.mxu0 %v1412_v30  ;;  %v1532_v30 = vrot.slane %v2809_v18, 7  ;;  %v2060_v18 = vld [vmem:[#allocation7 + $0x38] sm:$0xff]  }
 0x724   :  { %1544 = vmatpush1.bf16.msra.mxu1 %v2198_v32  ;;  %1585 = vmatpush1.bf16.msra.mxu0 %v2199_v42 }
 0x725   :  { %1545 = vmatprep.subr.bf16.mxu1 %v2200_v25  ;;  %1586 = vmatprep.subr.bf16.mxu0 %v2201_v17 }
 0x726   :  { %1575 = vmatprep.mubr.bf16.mxu1 %v2345_v38  ;;  %1616 = vmatprep.mubr.bf16.mxu0 %v2345_v38  ;;  %v2212_v38 = vld [vmem:[#allocation4 + $0x64] ss:$16 sps:$4 sm:$0xff]  }
 0x728   :  { %1546 = vmatpush1.bf16.msra.mxu1 %v2202_v27  ;;  %1587 = vmatpush1.bf16.msra.mxu0 %v2203_v41 }
 0x729   :  { %1547 = vmatprep.subr.bf16.mxu1 %v2204_v39  ;;  %1588 = vmatprep.subr.bf16.mxu0 %v2205_v40 }
 0x72c   :  { %1548 = vmatpush1.bf16.msra.mxu1 %v2206_v35  ;;  %1589 = vmatpush1.bf16.msra.mxu0 %v2207_v24 }
 0x72d   :  { %1549 = vmatprep.subr.bf16.mxu1 %v2208_v33  ;;  %1590 = vmatprep.subr.bf16.mxu0 %v2209_v43  ;;  %v2061_v43 = vld [vmem:[#allocation7 + $0x30] sm:$0xff]  }
 0x730   :  { %1550 = vmatpush1.bf16.msra.mxu1 %v2210_v47  ;;  %1591 = vmatpush1.bf16.msra.mxu0 %v2211_v50  ;;  %v2062_v47 = vld [vmem:[#allocation7 + $0x28] sm:$0xff]   ;;  %v2064_v50 = vld [vmem:[#allocation7 + $0x18] sm:$0xff]  }
 0x731   :  { %1551 = vmatprep.subr.bf16.mxu1 %v2212_v38  ;;  %1592 = vmatprep.subr.bf16.mxu0 %v2213_v15  ;;  %v2065_v38 = vld [vmem:[#allocation7 + $0x10] sm:$0xff]   ;;  %v2066_v15 = vld [vmem:[#allocation7 + $0x8] sm:$0xff]  }
 0x734   :  { %1552 = vmatpush1.bf16.msra.mxu1 %v2214_v16  ;;  %1593 = vmatpush1.bf16.msra.mxu0 %v2215_v44  ;;  %v2067_v16 = vld [vmem:[#allocation7] sm:$0xff]  }
 0x735   :  { %1553 = vmatprep.subr.bf16.mxu1 %v2216_v45  ;;  %1594 = vmatprep.subr.bf16.mxu0 %v2217_v46 }
 0x738   :  { %1554 = vmatpush1.bf16.msra.mxu1 %v2218_v48  ;;  %1595 = vmatpush1.bf16.msra.mxu0 %v2219_v49 }
 0x739   :  { %1555 = vmatprep.subr.bf16.mxu1 %v2220_v51  ;;  %1596 = vmatprep.subr.bf16.mxu0 %v2221_v52 }
 0x73c   :  { %1556 = vmatpush1.bf16.msra.mxu1 %v2222_v53  ;;  %1597 = vmatpush1.bf16.msra.mxu0 %v2223_v54 }
 0x73d   :  { %1557 = vmatprep.subr.bf16.mxu1 %v2224_v55  ;;  %1598 = vmatprep.subr.bf16.mxu0 %v2225_v56 }
 0x740   :  { %1558 = vmatpush1.bf16.msra.mxu1 %v2226_v57  ;;  %1599 = vmatpush1.bf16.msra.mxu0 %v2227_v58 }
 0x741   :  { %1931 = vmatprep.subr.bf16.mxu1 %v2343_v0 }
 0x7e3   :  { %v1448_v59 = vpop.f32.mrf.mxu1  ;;  %v1489_v60 = vpop.f32.mrf.mxu0 }
 0x7e4   :  { %v1500_v61 = vrot.slane %v1448_v59, 2  ;;  %v1502_v12 = vrot.slane %v1489_v60, 2 }
 0x7e5   :  { %v1450_v62 = vpop.f32.mrf.mxu1  ;;  %v1491_v63 = vpop.f32.mrf.mxu0 }
 0x7e6   :  { %v1508_v1 = vadd.f32 %v1500_v61, %v2567_v31  ;;  %v1501_v2 = vrot.slane %v1450_v62, 2  ;;  %v1503_v10 = vrot.slane %v1491_v63, 2  ;;  %v1510_v19 = vadd.f32 %v1502_v12, %v2576_v23 }
 0x7e7   :  { %v1452_v3 = vpop.f32.mrf.mxu1  ;;  %v1493_v4 = vpop.f32.mrf.mxu0 }
 0x7e8   :  { %v1899_v5 = vmul.f32 -1.442695, %v1508_v1  ;;  %v1509_v6 = vadd.f32 %v1501_v2, %v2569_v34  ;;  %v1511_v11 = vadd.f32 %v1503_v10, %v2573_v21 }
 0x7e9   :  { %v1453_v7 = vpop.f32.mrf.mxu1  ;;  %v1494_v8 = vpop.f32.mrf.mxu0 }
 0x7ea   :  { %2164 = vpow2.f32 %v1899_v5  ;;  %v1900_v9 = vmul.f32 -1.442695, %v1509_v6  ;;  %v1901_v13 = vmul.f32 -1.442695, %v1511_v11 }
 0x7ec   :  { %2166 = vpow2.f32 %v1900_v9 }
 0x7ed   :  { %2168 = vpow2.f32 %v1901_v13 }
 0x7f7   :  { %v2165_v28 = vpop.eup %2164 }
 0x7f8   :  { %v1515_v20 = vadd.f32 1.0, %v2165_v28 }
 0x7f9   :  { %v2167_v36 = vpop.eup %2166 }
 0x7fa   :  { %2170 = vrcp.f32 %v1515_v20  ;;  %v1521_v37 = vadd.f32 1.0, %v2167_v36  ;;  %v2169_v22 = vpop.eup %2168 }
 0x7fb   :  { %2172 = vtanh.f32 %v1510_v19  ;;  %v1528_v42 = vadd.f32 1.0, %v2169_v22 }
 0x7fc   :  { %2174 = vrcp.f32 %v1521_v37  ;;  %v1905_v37 = vld [vmem:[#allocation9] ss:$0 sm:$0xff] }
 0x7fd   :  { %2176 = vrcp.f32 %v1528_v42 }
 0x807   :  { %v2171_v14 = vpop.eup %2170 }
 0x808   :  { %v2173_v29 = vpop.eup %2172 }
 0x809   :  { %v2175_v32 = vpop.eup %2174  ;;  %v1535_v25 = vmul.f32 %v2173_v29, %v2171_v14 }
 0x80a   :  { %v1534_v17 = vmul.f32 %v2175_v32, %v1532_v30  ;;  %v2177_v41 = vpop.eup %2176 }
 0x80c   :  { %v2823_v27 = vadd.f32 %v1535_v25, %v1534_v17 }
 0x80e   :  { %2178 = vtanh.f32 %v2823_v27  ;;  %v1661_v6 = vrot.slane %v2823_v27, 7 }
 0x81b   :  { %v2179_v39 = vpop.eup %2178 }
 0x81c   :  { %v1538_v40 = vmul.f32 %v2179_v39, %v2177_v41 }
 0x81e   :  { %v1539_v35 = vpack.c.bf16 %v1538_v40, %v1538_v40  ;;  %v2827_v24 = vsel %vm1686_vm7, %v2813_v26, %v1538_v40  ;;  %v2063_v26 = vld [vmem:[#allocation7 + $0x20] sm:$0xff]  }
 0x820   :  { %v1541_v33 = vrot.slane %v1539_v35, 3 }
 0x822   :  { %1576 = vmatmul.mubr.bf16.vlgmr.msra.gmra.mxu1 %v1541_v33  ;;  %1617 = vmatmul.mubr.bf16.vlgmr.msra.gmra.mxu0 %v1541_v33 }
 0x823   :  { %1947 = vmatprep.mubr.msk.bf16.mxu1 %vm2344_vm0, %v2343_v0  ;;  %1932 = vmatpush3.bf16.msra.mxu1 %v2060_v18 }
 0x824   :  { %1933 = vmatprep.subr.bf16.mxu1 %v2343_v0 }
 0x827   :  { %1934 = vmatpush3.bf16.msra.mxu1 %v2061_v43 }
 0x828   :  { %1935 = vmatprep.subr.bf16.mxu1 %v2343_v0 }
 0x82b   :  { %1936 = vmatpush3.bf16.msra.mxu1 %v2062_v47 }
 0x82c   :  { %1937 = vmatprep.subr.bf16.mxu1 %v2343_v0 }
 0x82f   :  { %1938 = vmatpush3.bf16.msra.mxu1 %v2063_v26 }
 0x830   :  { %1939 = vmatprep.subr.bf16.mxu1 %v2343_v0 }
 0x833   :  { %1940 = vmatpush3.bf16.msra.mxu1 %v2064_v50 }
 0x834   :  { %1941 = vmatprep.subr.bf16.mxu1 %v2343_v0 }
 0x837   :  { %1942 = vmatpush3.bf16.msra.mxu1 %v2065_v38 }
 0x838   :  { %1943 = vmatprep.subr.bf16.mxu1 %v2343_v0 }
 0x83b   :  { %1944 = vmatpush3.bf16.msra.mxu1 %v2066_v15 }
 0x83c   :  { %1945 = vmatprep.subr.bf16.mxu1 %v2343_v0 }
 0x83f   :  { %1946 = vmatpush3.bf16.msra.mxu1 %v2067_v16 }
 0x8e2   :  { %v1577_v44 = vpop.f32.mrf.mxu1  ;;  %v1618_v45 = vpop.f32.mrf.mxu0 }
 0x8e3   :  { %v1629_v46 = vrot.slane %v1577_v44, 1  ;;  %v1631_v61 = vrot.slane %v1618_v45, 1 }
 0x8e4   :  { %v1579_v48 = vpop.f32.mrf.mxu1  ;;  %v1620_v49 = vpop.f32.mrf.mxu0 }
 0x8e5   :  { %v1637_v51 = vadd.f32 %v1629_v46, %v2567_v31  ;;  %v1630_v52 = vrot.slane %v1579_v48, 1  ;;  %v1632_v0 = vrot.slane %v1620_v49, 1  ;;  %v1639_v1 = vadd.f32 %v1631_v61, %v2576_v23 }
 0x8e6   :  { %v1581_v53 = vpop.f32.mrf.mxu1  ;;  %v1622_v54 = vpop.f32.mrf.mxu0 }
 0x8e7   :  { %v1902_v55 = vmul.f32 -1.442695, %v1637_v51  ;;  %v1638_v56 = vadd.f32 %v1630_v52, %v2569_v34  ;;  %v1640_v60 = vadd.f32 %v1632_v0, %v2573_v21 }
 0x8e8   :  { %v1582_v57 = vpop.f32.mrf.mxu1  ;;  %v1623_v58 = vpop.f32.mrf.mxu0 }
 0x8e9   :  { %2180 = vpow2.f32 %v1902_v55  ;;  %v1903_v59 = vmul.f32 -1.442695, %v1638_v56  ;;  %v1904_v62 = vmul.f32 -1.442695, %v1640_v60 }
 0x8eb   :  { %2182 = vpow2.f32 %v1903_v59 }
 0x8ec   :  { %2184 = vpow2.f32 %v1904_v62 }
 0x8f6   :  { %v2181_v63 = vpop.eup %2180 }
 0x8f7   :  { %v1644_v31 = vadd.f32 1.0, %v2181_v63 }
 0x8f8   :  { %v2183_v2 = vpop.eup %2182 }
 0x8f9   :  { %2186 = vrcp.f32 %v1644_v31  ;;  %v1650_v3 = vadd.f32 1.0, %v2183_v2  ;;  %v2185_v34 = vpop.eup %2184 }
 0x8fa   :  { %2188 = vtanh.f32 %v1639_v1  ;;  %v1657_v8 = vadd.f32 1.0, %v2185_v34 }
 0x8fb   :  { %2190 = vrcp.f32 %v1650_v3 }
 0x8fc   :  { %2192 = vrcp.f32 %v1657_v8 }
 0x906   :  { %v2187_v4 = vpop.eup %2186 }
 0x907   :  { %v2189_v5 = vpop.eup %2188 }
 0x908   :  { %v2191_v7 = vpop.eup %2190  ;;  %v1664_v21 = vmul.f32 %v2189_v5, %v2187_v4 }
 0x909   :  { %v1663_v9 = vmul.f32 %v2191_v7, %v1661_v6  ;;  %v2193_v23 = vpop.eup %2192 }
 0x90b   :  { %v1665_v10 = vadd.f32 %v1664_v21, %v1663_v9 }
 0x90d   :  { %2194 = vtanh.f32 %v1665_v10  ;;  %v1672_v28 = vrot.slane %v1665_v10, 6 }
 0x91a   :  { %v2195_v11 = vpop.eup %2194 }
 0x91b   :  { %v1667_v12 = vmul.f32 %v2195_v11, %v2193_v23 }
 0x91d   :  { %v1669_v13 = vrot.slane %v1667_v12, 7  ;;  %v1689_v19 = vsel %vm1688_vm8, %v2827_v24, %v1667_v12 }
 0x91e   :  { %v1690_v20 = vpack.c.bf16 %v1689_v19, %v1689_v19 }
 0x91f   :  { %v1675_v36 = vsel %vm1674_vm2, %v1669_v13, %v1672_v28 }
 0x920   :  { %1676 = vst [vmem:[%s2861_s10] sm:$0x3] %v1675_v36  ;;  %1948 = vmatmul.mubr.bf16.vlgmr.msra.gmra.mxu1 %v1690_v20 }
 0x9e0   :  { %v1796_v22 = vpop.f32.mrf.mxu1 }
 0x9e1   :  { %v1797_v14 = vadd.f32 %v1905_v37, %v1796_v22 }
 0x9e2   :  { %v1949_v29 = vpop.f32.mrf.mxu1 }
 0x9e3   :  { %1802 = vst [vmem:[%s2860_s9] sm:$0xff] %v1797_v14 }
 0x9e4   :  { %v1799_v30 = vpop.f32.mrf.mxu1 }
 0x9e6   :  { %v1950_v32 = vpop.f32.mrf.mxu1 }
 0x9e7   :  { %1811 = vsyncpa [#allocation3], 1 }
 0x9e8   :  { %1812 = vsyncpa [#allocation5], 1 }
 0x9e9   :  { %1813 = vsyncpa [#allocation8], 1 }

</bundles_post_ra>
